<compile_context>
chip_gen: v7x
topology: tpu7x:2x2x1
jax: 0.10.0
libtpu: 0.0.40
codegen_flags: <defaults>
</compile_context>

<pallas_src>
import functools
import math

import numpy as np
import jax
import jax.numpy as jnp
from jax import lax
from jax.experimental import pallas as pl
from jax.experimental.pallas import tpu as pltpu

PARAM_NAMES = ("body.weight", "body.bias", "head.weight", "head.bias")
IS_HEAD = (False, False, True, True)     # head params use lr_head
IS_BIAS = (False, True, False, True)     # biases may get the uninformative prior


# ----------------------------------------------------------------------------
# The single fused kernel: forward + cross-entropy + backward + Adam-SGHMC step
# ----------------------------------------------------------------------------
def _fused_step_kernel(*refs, n_t, beta1, beta2, eps, alpha, inv_T, inv_B,
                       bias_uninformative, is_head, is_bias):
    # ---- ref layout (inputs then outputs) ----------------------------------
    scal_ref, x_ref, y_ref = refs[0], refs[1], refs[2]
    p_refs = refs[3:3 + n_t]
    p0_refs = refs[3 + n_t:3 + 2 * n_t]
    m_refs = refs[3 + 2 * n_t:3 + 3 * n_t]
    v_refs = refs[3 + 3 * n_t:3 + 4 * n_t]
    mo_refs = refs[3 + 4 * n_t:3 + 5 * n_t]
    nz_refs = refs[3 + 5 * n_t:3 + 6 * n_t]
    outs = refs[3 + 6 * n_t:]
    loss_ref, logits_ref = outs[0], outs[1]
    op_refs = outs[2:2 + n_t]
    om_refs = outs[2 + n_t:2 + 2 * n_t]
    ov_refs = outs[2 + 2 * n_t:2 + 3 * n_t]
    omo_refs = outs[2 + 3 * n_t:2 + 4 * n_t]

    f32 = jnp.float32

    # ---- forward: h = relu(x W1 + b1); logits = h W2 + b2 ------------------
    x = x_ref[...]
    y = y_ref[...]                      # (B, 1) int32 labels
    w1 = p_refs[0][...]
    b1 = p_refs[1][...]
    w2 = p_refs[2][...]
    b2 = p_refs[3][...]

    z1 = jnp.dot(x, w1, preferred_element_type=f32) + b1
    h = jnp.maximum(z1, 0.0)
    logits = jnp.dot(h, w2, preferred_element_type=f32) + b2
    logits_ref[...] = logits

    # one-hot labels built in-kernel (no jax.nn.one_hot glue op)
    y1h = (lax.broadcasted_iota(jnp.int32, logits.shape, 1) == y).astype(f32)

    # ---- mean cross-entropy loss (reduced to (1,1) inside the kernel) ------
    mx = jnp.max(logits, axis=-1, keepdims=True)
    e = jnp.exp(logits - mx)
    se = jnp.sum(e, axis=-1, keepdims=True)
    nll = (jnp.log(se) + mx) - jnp.sum(logits * y1h, axis=-1, keepdims=True)
    loss_ref[...] = jnp.sum(nll, axis=0, keepdims=True) * inv_B

    # ---- backward of mean cross entropy (same math as loss.backward()) -----
    softmax = e / se
    dlogits = (softmax - y1h) * inv_B                              # (B, C)
    dw2 = lax.dot_general(h, dlogits, (((0,), (0,)), ((), ())),
                          preferred_element_type=f32)              # (H, C)
    db2 = jnp.sum(dlogits, axis=0, keepdims=True)                  # (1, C)
    dh = lax.dot_general(dlogits, w2, (((1,), (1,)), ((), ())),
                         preferred_element_type=f32)               # (B, H)
    dz1 = jnp.where(z1 > 0.0, dh, 0.0)
    dw1 = lax.dot_general(x, dz1, (((0,), (0,)), ((), ())),
                          preferred_element_type=f32)              # (Din, H)
    db1 = jnp.sum(dz1, axis=0, keepdims=True)                      # (1, H)
    grads = (dw1, db1, dw2, db2)

    # ---- per-step scalars from SMEM ----------------------------------------
    bc1 = scal_ref[0]          # 1 / (1 - beta1**t)
    bc2 = scal_ref[1]          # 1 / (1 - beta2**t)
    lr_body = scal_ref[2]
    lr_head = scal_ref[3]
    prior_c = scal_ref[4]      # 1 / (prior_sig^2 * N * T)
    ncoef_body = scal_ref[5]   # nd * sqrt(2 * alpha * lr_body * T / N)
    ncoef_head = scal_ref[6]   # nd * sqrt(2 * alpha * lr_head * T / N)

    # ---- Adam-SGHMC update for every parameter tensor (unrolled) -----------
    for i in range(n_t):
        p = p_refs[i][...]
        g = grads[i]
        m = m_refs[i][...]
        v = v_refs[i][...]
        mo = mo_refs[i][...]
        nz = nz_refs[i][...]

        lr = lr_head if is_head[i] else lr_body
        ncoef = ncoef_head if is_head[i] else ncoef_body

        if is_bias[i] and bias_uninformative:
            grad_u = g * inv_T
        else:
            grad_u = g * inv_T + prior_c * (p - p0_refs[i][...])

        m_new = beta1 * m + (1.0 - beta1) * grad_u
        v_new = beta2 * v + (1.0 - beta2) * (grad_u * grad_u)
        inv_den = 1.0 / (jnp.sqrt(v_new * bc2) + eps)     # full Adam preconditioner
        mo_new = ((1.0 - alpha) * mo
                  - (lr * bc1) * (m_new * inv_den)        # -lr * m_hat / denom
                  + (ncoef * inv_den) * nz)               # noise_scale * randn

        op_refs[i][...] = p + mo_new
        om_refs[i][...] = m_new
        ov_refs[i][...] = v_new
        omo_refs[i][...] = mo_new


def _make_fused_call(B, C, shapes, *, beta1, beta2, eps, alpha, inv_T, inv_B,
                     bias_uninformative):
    f32 = jnp.float32
    n_t = len(shapes)
    vmem = pl.BlockSpec(memory_space=pltpu.MemorySpace.VMEM)
    smem = pl.BlockSpec(memory_space=pltpu.MemorySpace.SMEM)

    in_specs = [smem, vmem, vmem] + [vmem] * (6 * n_t)
    out_shape = tuple(
        [jax.ShapeDtypeStruct((1, 1), f32),                     # loss
         jax.ShapeDtypeStruct((B, C), f32)]                     # logits
        + [jax.ShapeDtypeStruct(s, f32) for s in shapes] * 4)   # p, m, v, mom
    out_specs = tuple([vmem] * len(out_shape))

    # in-place state: params/m/v/momentum alias their outputs
    aliases = {}
    for i in range(n_t):
        aliases[3 + i] = 2 + i                        # params  -> new params
        aliases[3 + 2 * n_t + i] = 2 + n_t + i        # m       -> new m
        aliases[3 + 3 * n_t + i] = 2 + 2 * n_t + i    # v       -> new v
        aliases[3 + 4 * n_t + i] = 2 + 3 * n_t + i    # momentum-> new momentum

    kernel = functools.partial(
        _fused_step_kernel, n_t=n_t, beta1=beta1, beta2=beta2, eps=eps,
        alpha=alpha, inv_T=inv_T, inv_B=inv_B,
        bias_uninformative=bias_uninformative, is_head=IS_HEAD, is_bias=IS_BIAS)

    return pl.pallas_call(
        kernel,
        out_shape=out_shape,
        in_specs=in_specs,
        out_specs=out_specs,
        input_output_aliases=aliases,
    )


# ----------------------------------------------------------------------------
# Adam-SGHMC Model (JAX/Pallas port of the PyTorch module)
# ----------------------------------------------------------------------------
class AdamSGHMCModel:
    # TODO(synk): the PyTorch Model is generic over (net, criterion); this port
    # instantiates the workhorse net as a fixed 2-layer ReLU MLP with a
    # cross-entropy criterion (readout_name == "head").
    def __init__(self, ND, prior_sig=1.0, bias="informative", momentum_decay=0.05,
                 beta1=0.9, beta2=0.999, epsilon=1e-8, temperature=1.0):
        self.ND = ND
        self.prior_sig = prior_sig
        self.bias = bias
        self.momentum_decay = momentum_decay
        self.beta1 = beta1
        self.beta2 = beta2
        self.epsilon = epsilon
        self.temperature = temperature
        self.t = 0
        self._step = None
        self._m = self._v = self._mom = None

    def _build(self, x, params):
        B = x.shape[0]
        C = params["head.weight"].shape[1]
        shapes = tuple(tuple(int(d) for d in params[n].shape) for n in PARAM_NAMES)
        total = sum(int(np.prod(s)) for s in shapes)

        fused = _make_fused_call(
            B, C, shapes,
            beta1=self.beta1, beta2=self.beta2, eps=self.epsilon,
            alpha=self.momentum_decay, inv_T=1.0 / self.temperature,
            inv_B=1.0 / B, bias_uninformative=(self.bias == "uninformative"))

        beta1, beta2 = self.beta1, self.beta2
        alpha, T, prior_sig = self.momentum_decay, self.temperature, self.prior_sig
        n_t = len(PARAM_NAMES)

        def step(x, y, p_list, p0_list, m_list, v_list, mo_list,
                 t, lr_body, lr_head, N, nd, key):
            f32 = jnp.float32
            tf = jnp.asarray(t, f32)
            bc1 = 1.0 / (1.0 - beta1 ** tf)
            bc2 = 1.0 / (1.0 - beta2 ** tf)
            prior_c = 1.0 / (prior_sig ** 2 * N * T)
            nb = nd * jnp.sqrt(2.0 * alpha * lr_body * T / N)
            nh = nd * jnp.sqrt(2.0 * alpha * lr_head * T / N)
            scal = jnp.stack([bc1, bc2, lr_body, lr_head, prior_c, nb, nh]
                             ).astype(f32)

            # single threefry launch; sliced/reshaped per tensor (tiny copies)
            noise = jax.random.normal(key, (total,), f32)
            nz_list, off = [], 0
            for s in shapes:
                sz = int(np.prod(s))
                nz_list.append(lax.slice(noise, (off,), (off + sz,)).reshape(s))
                off += sz

            y2d = y.reshape(B, 1).astype(jnp.int32)
            outs = fused(scal, x, y2d, *p_list, *p0_list, *m_list, *v_list,
                         *mo_list, *nz_list)

            loss = outs[0].reshape(())
            logits = outs[1]
            new_p = list(outs[2:2 + n_t])
            new_m = list(outs[2 + n_t:2 + 2 * n_t])
            new_v = list(outs[2 + 2 * n_t:2 + 3 * n_t])
            new_mo = list(outs[2 + 3 * n_t:2 + 4 * n_t])
            return loss, logits, new_p, new_m, new_v, new_mo

        # t / lr / N / nd are traced args -> one executable for all steps
        self._step = jax.jit(step)

    def forward(self, x, y, params, params0, lrs, noise_key, Ninflate=1.0, nd=1.0):
        if self._step is None:
            self._build(x, params)
        if self._m is None:
            self._m = [jnp.zeros_like(params[n]) for n in PARAM_NAMES]
            self._v = [jnp.zeros_like(params[n]) for n in PARAM_NAMES]
            self._mom = [jnp.zeros_like(params[n]) for n in PARAM_NAMES]

        if len(lrs) == 1:
            lr_body = lr_head = lrs[0]
        else:
            lr_body, lr_head = lrs[0], lrs[1]
        N = self.ND * Ninflate
        self.t += 1

        p_list = [params[n] for n in PARAM_NAMES]
        p0_list = [params0[n] for n in PARAM_NAMES]
        (loss, logits, new_p,
         self._m, self._v, self._mom) = self._step(
            x, y, p_list, p0_list, self._m, self._v, self._mom,
            self.t, float(lr_body), float(lr_head), float(N), float(nd),
            noise_key)

        new_params = {n: new_p[i] for i, n in enumerate(PARAM_NAMES)}
        # loss stays a device scalar (no per-step host sync); use float(loss)
        # only when a Python number is required.
        return loss, logits, new_params


# ----------------------------------------------------------------------------
if __name__ == "__main__":
    key = jax.random.PRNGKey(0)
    B, Din, H, C = 8, 32, 32, 16  # batch, input dim, hidden, classes

    k_x, k_y, k_w1, k_w2, k_noise = jax.random.split(key, 5)
    x = jax.random.normal(k_x, (B, Din), dtype=jnp.float32)
    y = jax.random.randint(k_y, (B,), 0, C, dtype=jnp.int32)

    params = {
        "body.weight": 0.1 * jax.random.normal(k_w1, (Din, H), dtype=jnp.float32),
        "body.bias": jnp.zeros((1, H), dtype=jnp.float32),
        "head.weight": 0.1 * jax.random.normal(k_w2, (H, C), dtype=jnp.float32),
        "head.bias": jnp.zeros((1, C), dtype=jnp.float32),
    }
    params0 = {k: jnp.zeros_like(v) for k, v in params.items()}  # prior means

    model = AdamSGHMCModel(ND=1000, prior_sig=1.0, bias="informative",
                           momentum_decay=0.05, temperature=1.0)

    cur = params
    loss = out = None
    for step in range(3):  # several steps: exercises the no-recompile path
        k_step = jax.random.fold_in(k_noise, step)
        loss, out, cur = model.forward(x, y, cur, params0, lrs=[1e-3, 1e-4],
                                       noise_key=k_step, Ninflate=1.0, nd=1.0)

    jax.block_until_ready(out)
    jax.tree_util.tree_map(jax.block_until_ready, cur)

    assert out.shape == (B, C)
    assert math.isfinite(float(loss))
    assert all(bool(jnp.all(jnp.isfinite(v))) for v in cur.values())
    print("KERNEL_OK")
</pallas_src>

<mosaic_0001>
module attributes {stable_mosaic.version = 11 : i64} {
  func.func @_fused_step_kernel(%arg0: memref<7xf32, #tpu.memory_space<smem>>, %arg1: memref<8x32xf32, #tpu.memory_space<vmem>>, %arg2: memref<8x1xi32, #tpu.memory_space<vmem>>, %arg3: memref<32x32xf32, #tpu.memory_space<vmem>>, %arg4: memref<1x32xf32, #tpu.memory_space<vmem>>, %arg5: memref<32x16xf32, #tpu.memory_space<vmem>>, %arg6: memref<1x16xf32, #tpu.memory_space<vmem>>, %arg7: memref<32x32xf32, #tpu.memory_space<vmem>>, %arg8: memref<1x32xf32, #tpu.memory_space<vmem>>, %arg9: memref<32x16xf32, #tpu.memory_space<vmem>>, %arg10: memref<1x16xf32, #tpu.memory_space<vmem>>, %arg11: memref<32x32xf32, #tpu.memory_space<vmem>>, %arg12: memref<1x32xf32, #tpu.memory_space<vmem>>, %arg13: memref<32x16xf32, #tpu.memory_space<vmem>>, %arg14: memref<1x16xf32, #tpu.memory_space<vmem>>, %arg15: memref<32x32xf32, #tpu.memory_space<vmem>>, %arg16: memref<1x32xf32, #tpu.memory_space<vmem>>, %arg17: memref<32x16xf32, #tpu.memory_space<vmem>>, %arg18: memref<1x16xf32, #tpu.memory_space<vmem>>, %arg19: memref<32x32xf32, #tpu.memory_space<vmem>>, %arg20: memref<1x32xf32, #tpu.memory_space<vmem>>, %arg21: memref<32x16xf32, #tpu.memory_space<vmem>>, %arg22: memref<1x16xf32, #tpu.memory_space<vmem>>, %arg23: memref<32x32xf32, #tpu.memory_space<vmem>>, %arg24: memref<1x32xf32, #tpu.memory_space<vmem>>, %arg25: memref<32x16xf32, #tpu.memory_space<vmem>>, %arg26: memref<1x16xf32, #tpu.memory_space<vmem>>, %arg27: memref<1x1xf32, #tpu.memory_space<vmem>>, %arg28: memref<8x16xf32, #tpu.memory_space<vmem>>, %arg29: memref<32x32xf32, #tpu.memory_space<vmem>>, %arg30: memref<1x32xf32, #tpu.memory_space<vmem>>, %arg31: memref<32x16xf32, #tpu.memory_space<vmem>>, %arg32: memref<1x16xf32, #tpu.memory_space<vmem>>, %arg33: memref<32x32xf32, #tpu.memory_space<vmem>>, %arg34: memref<1x32xf32, #tpu.memory_space<vmem>>, %arg35: memref<32x16xf32, #tpu.memory_space<vmem>>, %arg36: memref<1x16xf32, #tpu.memory_space<vmem>>, %arg37: memref<32x32xf32, #tpu.memory_space<vmem>>, %arg38: memref<1x32xf32, #tpu.memory_space<vmem>>, %arg39: memref<32x16xf32, #tpu.memory_space<vmem>>, %arg40: memref<1x16xf32, #tpu.memory_space<vmem>>, %arg41: memref<32x32xf32, #tpu.memory_space<vmem>>, %arg42: memref<1x32xf32, #tpu.memory_space<vmem>>, %arg43: memref<32x16xf32, #tpu.memory_space<vmem>>, %arg44: memref<1x16xf32, #tpu.memory_space<vmem>>) attributes {dimension_semantics = [], scalar_prefetch = 0 : i64, scratch_operands = 0 : i64, tpu.core_type = #tpu.core_type<tc>} {
    %c0 = arith.constant 0 : index
    %c0_0 = arith.constant 0 : index
    %0 = vector.load %arg1[%c0, %c0_0] : memref<8x32xf32, #tpu.memory_space<vmem>>, vector<8x32xf32>
    %c0_1 = arith.constant 0 : index
    %c0_2 = arith.constant 0 : index
    %1 = vector.load %arg2[%c0_1, %c0_2] : memref<8x1xi32, #tpu.memory_space<vmem>>, vector<8x1xi32>
    %c0_3 = arith.constant 0 : index
    %c0_4 = arith.constant 0 : index
    %2 = vector.load %arg3[%c0_3, %c0_4] : memref<32x32xf32, #tpu.memory_space<vmem>>, vector<32x32xf32>
    %c0_5 = arith.constant 0 : index
    %c0_6 = arith.constant 0 : index
    %3 = vector.load %arg4[%c0_5, %c0_6] : memref<1x32xf32, #tpu.memory_space<vmem>>, vector<1x32xf32>
    %c0_7 = arith.constant 0 : index
    %c0_8 = arith.constant 0 : index
    %4 = vector.load %arg5[%c0_7, %c0_8] : memref<32x16xf32, #tpu.memory_space<vmem>>, vector<32x16xf32>
    %c0_9 = arith.constant 0 : index
    %c0_10 = arith.constant 0 : index
    %5 = vector.load %arg6[%c0_9, %c0_10] : memref<1x16xf32, #tpu.memory_space<vmem>>, vector<1x16xf32>
    %cst = arith.constant dense<0.000000e+00> : vector<8x32xf32>
    %6 = tpu.matmul %0, %2, %cst {dimension_numbers = #tpu.dot_dimension_numbers<[1], [0], [0], [1], [0, 0, 1, 1], [], []>} : vector<8x32xf32>, vector<32x32xf32>, vector<8x32xf32> -> vector<8x32xf32>
    %7 = vector.broadcast %3 : vector<1x32xf32> to vector<8x32xf32>
    %8 = arith.addf %6, %7 : vector<8x32xf32>
    %cst_11 = arith.constant 0.000000e+00 : f32
    %9 = vector.broadcast %cst_11 : f32 to vector<8x32xf32>
    %10 = arith.maximumf %8, %9 : vector<8x32xf32>
    %cst_12 = arith.constant dense<0.000000e+00> : vector<8x16xf32>
    %11 = tpu.matmul %10, %4, %cst_12 {dimension_numbers = #tpu.dot_dimension_numbers<[1], [0], [0], [1], [0, 0, 1, 1], [], []>} : vector<8x32xf32>, vector<32x16xf32>, vector<8x16xf32> -> vector<8x16xf32>
    %12 = vector.broadcast %5 : vector<1x16xf32> to vector<8x16xf32>
    %13 = arith.addf %11, %12 : vector<8x16xf32>
    %c0_13 = arith.constant 0 : index
    %c0_14 = arith.constant 0 : index
    %14 = vector.load %arg28[%c0_13, %c0_14] : memref<8x16xf32, #tpu.memory_space<vmem>>, vector<8x16xf32>
    tpu.vector_store %arg28[%c0_13, %c0_14], %13 {strides = array<i32>} : memref<8x16xf32, #tpu.memory_space<vmem>>, vector<8x16xf32>,
    %15 = tpu.iota {dimensions = array<i32: 1>} : vector<8x16xi32>
    %16 = vector.broadcast %1 : vector<8x1xi32> to vector<8x16xi32>
    %17 = arith.cmpi eq, %15, %16 : vector<8x16xi32>
    %18 = arith.extui %17 : vector<8x16xi1> to vector<8x16xi32>
    %19 = arith.sitofp %18 : vector<8x16xi32> to vector<8x16xf32>
    %cst_15 = arith.constant dense<0xFF800000> : vector<8xf32>
    %20 = vector.multi_reduction <maximumf>, %13, %cst_15 [1] : vector<8x16xf32> to vector<8xf32>
    %21 = vector.shape_cast %20 : vector<8xf32> to vector<8x1xf32>
    %22 = vector.broadcast %21 : vector<8x1xf32> to vector<8x16xf32>
    %23 = arith.subf %13, %22 : vector<8x16xf32>
    %24 = math.exp %23 : vector<8x16xf32>
    %cst_16 = arith.constant dense<0.000000e+00> : vector<8xf32>
    %25 = vector.multi_reduction <add>, %24, %cst_16 [1] : vector<8x16xf32> to vector<8xf32>
    %26 = vector.shape_cast %25 : vector<8xf32> to vector<8x1xf32>
    %27 = math.log %26 : vector<8x1xf32>
    %28 = arith.addf %27, %21 : vector<8x1xf32>
    %29 = arith.mulf %13, %19 : vector<8x16xf32>
    %cst_17 = arith.constant dense<0.000000e+00> : vector<8xf32>
    %30 = vector.multi_reduction <add>, %29, %cst_17 [1] : vector<8x16xf32> to vector<8xf32>
    %31 = vector.shape_cast %30 : vector<8xf32> to vector<8x1xf32>
    %32 = arith.subf %28, %31 : vector<8x1xf32>
    %cst_18 = arith.constant dense<0.000000e+00> : vector<1xf32>
    %33 = vector.multi_reduction <add>, %32, %cst_18 [0] : vector<8x1xf32> to vector<1xf32>
    %34 = vector.shape_cast %33 : vector<1xf32> to vector<1x1xf32>
    %cst_19 = arith.constant 1.250000e-01 : f32
    %35 = vector.broadcast %cst_19 : f32 to vector<1x1xf32>
    %36 = arith.mulf %34, %35 : vector<1x1xf32>
    %c0_20 = arith.constant 0 : index
    %c0_21 = arith.constant 0 : index
    %37 = vector.load %arg27[%c0_20, %c0_21] : memref<1x1xf32, #tpu.memory_space<vmem>>, vector<1x1xf32>
    tpu.vector_store %arg27[%c0_20, %c0_21], %36 {strides = array<i32>} : memref<1x1xf32, #tpu.memory_space<vmem>>, vector<1x1xf32>,
    %38 = vector.broadcast %26 : vector<8x1xf32> to vector<8x16xf32>
    %39 = arith.divf %24, %38 : vector<8x16xf32>
    %40 = arith.subf %39, %19 : vector<8x16xf32>
    %cst_22 = arith.constant 1.250000e-01 : f32
    %41 = vector.broadcast %cst_22 : f32 to vector<8x16xf32>
    %42 = arith.mulf %40, %41 : vector<8x16xf32>
    %cst_23 = arith.constant dense<0.000000e+00> : vector<32x16xf32>
    %43 = tpu.matmul %10, %42, %cst_23 {dimension_numbers = #tpu.dot_dimension_numbers<[0], [0], [1], [1], [0, 1, 1, 1], [], []>} : vector<8x32xf32>, vector<8x16xf32>, vector<32x16xf32> -> vector<32x16xf32>
    %cst_24 = arith.constant dense<0.000000e+00> : vector<16xf32>
    %44 = vector.multi_reduction <add>, %42, %cst_24 [0] : vector<8x16xf32> to vector<16xf32>
    %45 = vector.shape_cast %44 : vector<16xf32> to vector<1x16xf32>
    %cst_25 = arith.constant dense<0.000000e+00> : vector<8x32xf32>
    %46 = tpu.matmul %42, %4, %cst_25 {dimension_numbers = #tpu.dot_dimension_numbers<[1], [1], [0], [0], [0, 0, 1, 0], [], []>} : vector<8x16xf32>, vector<32x16xf32>, vector<8x32xf32> -> vector<8x32xf32>
    %cst_26 = arith.constant 0.000000e+00 : f32
    %47 = vector.broadcast %cst_26 : f32 to vector<8x32xf32>
    %48 = arith.cmpf ogt, %8, %47 : vector<8x32xf32>
    %cst_27 = arith.constant 0.000000e+00 : f32
    %49 = vector.broadcast %cst_27 : f32 to vector<8x32xf32>
    %50 = arith.select %48, %46, %49 : vector<8x32xi1>, vector<8x32xf32>
    %cst_28 = arith.constant dense<0.000000e+00> : vector<32x32xf32>
    %51 = tpu.matmul %0, %50, %cst_28 {dimension_numbers = #tpu.dot_dimension_numbers<[0], [0], [1], [1], [0, 1, 1, 1], [], []>} : vector<8x32xf32>, vector<8x32xf32>, vector<32x32xf32> -> vector<32x32xf32>
    %cst_29 = arith.constant dense<0.000000e+00> : vector<32xf32>
    %52 = vector.multi_reduction <add>, %50, %cst_29 [0] : vector<8x32xf32> to vector<32xf32>
    %53 = vector.shape_cast %52 : vector<32xf32> to vector<1x32xf32>
    %c0_30 = arith.constant 0 : index
    %54 = memref.load %arg0[%c0_30] : memref<7xf32, #tpu.memory_space<smem>>
    %c1 = arith.constant 1 : index
    %55 = memref.load %arg0[%c1] : memref<7xf32, #tpu.memory_space<smem>>
    %c2 = arith.constant 2 : index
    %56 = memref.load %arg0[%c2] : memref<7xf32, #tpu.memory_space<smem>>
    %c3 = arith.constant 3 : index
    %57 = memref.load %arg0[%c3] : memref<7xf32, #tpu.memory_space<smem>>
    %c4 = arith.constant 4 : index
    %58 = memref.load %arg0[%c4] : memref<7xf32, #tpu.memory_space<smem>>
    %c5 = arith.constant 5 : index
    %59 = memref.load %arg0[%c5] : memref<7xf32, #tpu.memory_space<smem>>
    %c6 = arith.constant 6 : index
    %60 = memref.load %arg0[%c6] : memref<7xf32, #tpu.memory_space<smem>>
    %c0_31 = arith.constant 0 : index
    %c0_32 = arith.constant 0 : index
    %61 = vector.load %arg3[%c0_31, %c0_32] : memref<32x32xf32, #tpu.memory_space<vmem>>, vector<32x32xf32>
    %c0_33 = arith.constant 0 : index
    %c0_34 = arith.constant 0 : index
    %62 = vector.load %arg11[%c0_33, %c0_34] : memref<32x32xf32, #tpu.memory_space<vmem>>, vector<32x32xf32>
    %c0_35 = arith.constant 0 : index
    %c0_36 = arith.constant 0 : index
    %63 = vector.load %arg15[%c0_35, %c0_36] : memref<32x32xf32, #tpu.memory_space<vmem>>, vector<32x32xf32>
    %c0_37 = arith.constant 0 : index
    %c0_38 = arith.constant 0 : index
    %64 = vector.load %arg19[%c0_37, %c0_38] : memref<32x32xf32, #tpu.memory_space<vmem>>, vector<32x32xf32>
    %c0_39 = arith.constant 0 : index
    %c0_40 = arith.constant 0 : index
    %65 = vector.load %arg23[%c0_39, %c0_40] : memref<32x32xf32, #tpu.memory_space<vmem>>, vector<32x32xf32>
    %cst_41 = arith.constant 1.000000e+00 : f32
    %66 = vector.broadcast %cst_41 : f32 to vector<32x32xf32>
    %67 = arith.mulf %51, %66 : vector<32x32xf32>
    %c0_42 = arith.constant 0 : index
    %c0_43 = arith.constant 0 : index
    %68 = vector.load %arg7[%c0_42, %c0_43] : memref<32x32xf32, #tpu.memory_space<vmem>>, vector<32x32xf32>
    %69 = arith.subf %61, %68 : vector<32x32xf32>
    %70 = vector.broadcast %58 : f32 to vector<32x32xf32>
    %71 = arith.mulf %70, %69 : vector<32x32xf32>
    %72 = arith.addf %67, %71 : vector<32x32xf32>
    %cst_44 = arith.constant 0.899999976 : f32
    %73 = vector.broadcast %cst_44 : f32 to vector<32x32xf32>
    %74 = arith.mulf %73, %62 : vector<32x32xf32>
    %cst_45 = arith.constant 1.000000e-01 : f32
    %75 = vector.broadcast %cst_45 : f32 to vector<32x32xf32>
    %76 = arith.mulf %75, %72 : vector<32x32xf32>
    %77 = arith.addf %74, %76 : vector<32x32xf32>
    %cst_46 = arith.constant 9.990000e-01 : f32
    %78 = vector.broadcast %cst_46 : f32 to vector<32x32xf32>
    %79 = arith.mulf %78, %63 : vector<32x32xf32>
    %80 = arith.mulf %72, %72 : vector<32x32xf32>
    %cst_47 = arith.constant 1.000000e-03 : f32
    %81 = vector.broadcast %cst_47 : f32 to vector<32x32xf32>
    %82 = arith.mulf %81, %80 : vector<32x32xf32>
    %83 = arith.addf %79, %82 : vector<32x32xf32>
    %84 = vector.broadcast %55 : f32 to vector<32x32xf32>
    %85 = arith.mulf %83, %84 : vector<32x32xf32>
    %86 = math.sqrt %85 : vector<32x32xf32>
    %cst_48 = arith.constant 9.99999993E-9 : f32
    %87 = vector.broadcast %cst_48 : f32 to vector<32x32xf32>
    %88 = arith.addf %86, %87 : vector<32x32xf32>
    %cst_49 = arith.constant 1.000000e+00 : f32
    %89 = vector.broadcast %cst_49 : f32 to vector<32x32xf32>
    %90 = arith.divf %89, %88 : vector<32x32xf32>
    %cst_50 = arith.constant 0.949999988 : f32
    %91 = vector.broadcast %cst_50 : f32 to vector<32x32xf32>
    %92 = arith.mulf %91, %64 : vector<32x32xf32>
    %93 = arith.mulf %56, %54 : f32
    %94 = arith.mulf %77, %90 : vector<32x32xf32>
    %95 = vector.broadcast %93 : f32 to vector<32x32xf32>
    %96 = arith.mulf %95, %94 : vector<32x32xf32>
    %97 = arith.subf %92, %96 : vector<32x32xf32>
    %98 = vector.broadcast %59 : f32 to vector<32x32xf32>
    %99 = arith.mulf %98, %90 : vector<32x32xf32>
    %100 = arith.mulf %99, %65 : vector<32x32xf32>
    %101 = arith.addf %97, %100 : vector<32x32xf32>
    %102 = arith.addf %61, %101 : vector<32x32xf32>
    %c0_51 = arith.constant 0 : index
    %c0_52 = arith.constant 0 : index
    %103 = vector.load %arg29[%c0_51, %c0_52] : memref<32x32xf32, #tpu.memory_space<vmem>>, vector<32x32xf32>
    tpu.vector_store %arg29[%c0_51, %c0_52], %102 {strides = array<i32>} : memref<32x32xf32, #tpu.memory_space<vmem>>, vector<32x32xf32>,
    %c0_53 = arith.constant 0 : index
    %c0_54 = arith.constant 0 : index
    %104 = vector.load %arg33[%c0_53, %c0_54] : memref<32x32xf32, #tpu.memory_space<vmem>>, vector<32x32xf32>
    tpu.vector_store %arg33[%c0_53, %c0_54], %77 {strides = array<i32>} : memref<32x32xf32, #tpu.memory_space<vmem>>, vector<32x32xf32>,
    %c0_55 = arith.constant 0 : index
    %c0_56 = arith.constant 0 : index
    %105 = vector.load %arg37[%c0_55, %c0_56] : memref<32x32xf32, #tpu.memory_space<vmem>>, vector<32x32xf32>
    tpu.vector_store %arg37[%c0_55, %c0_56], %83 {strides = array<i32>} : memref<32x32xf32, #tpu.memory_space<vmem>>, vector<32x32xf32>,
    %c0_57 = arith.constant 0 : index
    %c0_58 = arith.constant 0 : index
    %106 = vector.load %arg41[%c0_57, %c0_58] : memref<32x32xf32, #tpu.memory_space<vmem>>, vector<32x32xf32>
    tpu.vector_store %arg41[%c0_57, %c0_58], %101 {strides = array<i32>} : memref<32x32xf32, #tpu.memory_space<vmem>>, vector<32x32xf32>,
    %c0_59 = arith.constant 0 : index
    %c0_60 = arith.constant 0 : index
    %107 = vector.load %arg4[%c0_59, %c0_60] : memref<1x32xf32, #tpu.memory_space<vmem>>, vector<1x32xf32>
    %c0_61 = arith.constant 0 : index
    %c0_62 = arith.constant 0 : index
    %108 = vector.load %arg12[%c0_61, %c0_62] : memref<1x32xf32, #tpu.memory_space<vmem>>, vector<1x32xf32>
    %c0_63 = arith.constant 0 : index
    %c0_64 = arith.constant 0 : index
    %109 = vector.load %arg16[%c0_63, %c0_64] : memref<1x32xf32, #tpu.memory_space<vmem>>, vector<1x32xf32>
    %c0_65 = arith.constant 0 : index
    %c0_66 = arith.constant 0 : index
    %110 = vector.load %arg20[%c0_65, %c0_66] : memref<1x32xf32, #tpu.memory_space<vmem>>, vector<1x32xf32>
    %c0_67 = arith.constant 0 : index
    %c0_68 = arith.constant 0 : index
    %111 = vector.load %arg24[%c0_67, %c0_68] : memref<1x32xf32, #tpu.memory_space<vmem>>, vector<1x32xf32>
    %cst_69 = arith.constant 1.000000e+00 : f32
    %112 = vector.broadcast %cst_69 : f32 to vector<1x32xf32>
    %113 = arith.mulf %53, %112 : vector<1x32xf32>
    %c0_70 = arith.constant 0 : index
    %c0_71 = arith.constant 0 : index
    %114 = vector.load %arg8[%c0_70, %c0_71] : memref<1x32xf32, #tpu.memory_space<vmem>>, vector<1x32xf32>
    %115 = arith.subf %107, %114 : vector<1x32xf32>
    %116 = vector.broadcast %58 : f32 to vector<1x32xf32>
    %117 = arith.mulf %116, %115 : vector<1x32xf32>
    %118 = arith.addf %113, %117 : vector<1x32xf32>
    %cst_72 = arith.constant 0.899999976 : f32
    %119 = vector.broadcast %cst_72 : f32 to vector<1x32xf32>
    %120 = arith.mulf %119, %108 : vector<1x32xf32>
    %cst_73 = arith.constant 1.000000e-01 : f32
    %121 = vector.broadcast %cst_73 : f32 to vector<1x32xf32>
    %122 = arith.mulf %121, %118 : vector<1x32xf32>
    %123 = arith.addf %120, %122 : vector<1x32xf32>
    %cst_74 = arith.constant 9.990000e-01 : f32
    %124 = vector.broadcast %cst_74 : f32 to vector<1x32xf32>
    %125 = arith.mulf %124, %109 : vector<1x32xf32>
    %126 = arith.mulf %118, %118 : vector<1x32xf32>
    %cst_75 = arith.constant 1.000000e-03 : f32
    %127 = vector.broadcast %cst_75 : f32 to vector<1x32xf32>
    %128 = arith.mulf %127, %126 : vector<1x32xf32>
    %129 = arith.addf %125, %128 : vector<1x32xf32>
    %130 = vector.broadcast %55 : f32 to vector<1x32xf32>
    %131 = arith.mulf %129, %130 : vector<1x32xf32>
    %132 = math.sqrt %131 : vector<1x32xf32>
    %cst_76 = arith.constant 9.99999993E-9 : f32
    %133 = vector.broadcast %cst_76 : f32 to vector<1x32xf32>
    %134 = arith.addf %132, %133 : vector<1x32xf32>
    %cst_77 = arith.constant 1.000000e+00 : f32
    %135 = vector.broadcast %cst_77 : f32 to vector<1x32xf32>
    %136 = arith.divf %135, %134 : vector<1x32xf32>
    %cst_78 = arith.constant 0.949999988 : f32
    %137 = vector.broadcast %cst_78 : f32 to vector<1x32xf32>
    %138 = arith.mulf %137, %110 : vector<1x32xf32>
    %139 = arith.mulf %56, %54 : f32
    %140 = arith.mulf %123, %136 : vector<1x32xf32>
    %141 = vector.broadcast %139 : f32 to vector<1x32xf32>
    %142 = arith.mulf %141, %140 : vector<1x32xf32>
    %143 = arith.subf %138, %142 : vector<1x32xf32>
    %144 = vector.broadcast %59 : f32 to vector<1x32xf32>
    %145 = arith.mulf %144, %136 : vector<1x32xf32>
    %146 = arith.mulf %145, %111 : vector<1x32xf32>
    %147 = arith.addf %143, %146 : vector<1x32xf32>
    %148 = arith.addf %107, %147 : vector<1x32xf32>
    %c0_79 = arith.constant 0 : index
    %c0_80 = arith.constant 0 : index
    %149 = vector.load %arg30[%c0_79, %c0_80] : memref<1x32xf32, #tpu.memory_space<vmem>>, vector<1x32xf32>
    tpu.vector_store %arg30[%c0_79, %c0_80], %148 {strides = array<i32>} : memref<1x32xf32, #tpu.memory_space<vmem>>, vector<1x32xf32>,
    %c0_81 = arith.constant 0 : index
    %c0_82 = arith.constant 0 : index
    %150 = vector.load %arg34[%c0_81, %c0_82] : memref<1x32xf32, #tpu.memory_space<vmem>>, vector<1x32xf32>
    tpu.vector_store %arg34[%c0_81, %c0_82], %123 {strides = array<i32>} : memref<1x32xf32, #tpu.memory_space<vmem>>, vector<1x32xf32>,
    %c0_83 = arith.constant 0 : index
    %c0_84 = arith.constant 0 : index
    %151 = vector.load %arg38[%c0_83, %c0_84] : memref<1x32xf32, #tpu.memory_space<vmem>>, vector<1x32xf32>
    tpu.vector_store %arg38[%c0_83, %c0_84], %129 {strides = array<i32>} : memref<1x32xf32, #tpu.memory_space<vmem>>, vector<1x32xf32>,
    %c0_85 = arith.constant 0 : index
    %c0_86 = arith.constant 0 : index
    %152 = vector.load %arg42[%c0_85, %c0_86] : memref<1x32xf32, #tpu.memory_space<vmem>>, vector<1x32xf32>
    tpu.vector_store %arg42[%c0_85, %c0_86], %147 {strides = array<i32>} : memref<1x32xf32, #tpu.memory_space<vmem>>, vector<1x32xf32>,
    %c0_87 = arith.constant 0 : index
    %c0_88 = arith.constant 0 : index
    %153 = vector.load %arg5[%c0_87, %c0_88] : memref<32x16xf32, #tpu.memory_space<vmem>>, vector<32x16xf32>
    %c0_89 = arith.constant 0 : index
    %c0_90 = arith.constant 0 : index
    %154 = vector.load %arg13[%c0_89, %c0_90] : memref<32x16xf32, #tpu.memory_space<vmem>>, vector<32x16xf32>
    %c0_91 = arith.constant 0 : index
    %c0_92 = arith.constant 0 : index
    %155 = vector.load %arg17[%c0_91, %c0_92] : memref<32x16xf32, #tpu.memory_space<vmem>>, vector<32x16xf32>
    %c0_93 = arith.constant 0 : index
    %c0_94 = arith.constant 0 : index
    %156 = vector.load %arg21[%c0_93, %c0_94] : memref<32x16xf32, #tpu.memory_space<vmem>>, vector<32x16xf32>
    %c0_95 = arith.constant 0 : index
    %c0_96 = arith.constant 0 : index
    %157 = vector.load %arg25[%c0_95, %c0_96] : memref<32x16xf32, #tpu.memory_space<vmem>>, vector<32x16xf32>
    %cst_97 = arith.constant 1.000000e+00 : f32
    %158 = vector.broadcast %cst_97 : f32 to vector<32x16xf32>
    %159 = arith.mulf %43, %158 : vector<32x16xf32>
    %c0_98 = arith.constant 0 : index
    %c0_99 = arith.constant 0 : index
    %160 = vector.load %arg9[%c0_98, %c0_99] : memref<32x16xf32, #tpu.memory_space<vmem>>, vector<32x16xf32>
    %161 = arith.subf %153, %160 : vector<32x16xf32>
    %162 = vector.broadcast %58 : f32 to vector<32x16xf32>
    %163 = arith.mulf %162, %161 : vector<32x16xf32>
    %164 = arith.addf %159, %163 : vector<32x16xf32>
    %cst_100 = arith.constant 0.899999976 : f32
    %165 = vector.broadcast %cst_100 : f32 to vector<32x16xf32>
    %166 = arith.mulf %165, %154 : vector<32x16xf32>
    %cst_101 = arith.constant 1.000000e-01 : f32
    %167 = vector.broadcast %cst_101 : f32 to vector<32x16xf32>
    %168 = arith.mulf %167, %164 : vector<32x16xf32>
    %169 = arith.addf %166, %168 : vector<32x16xf32>
    %cst_102 = arith.constant 9.990000e-01 : f32
    %170 = vector.broadcast %cst_102 : f32 to vector<32x16xf32>
    %171 = arith.mulf %170, %155 : vector<32x16xf32>
    %172 = arith.mulf %164, %164 : vector<32x16xf32>
    %cst_103 = arith.constant 1.000000e-03 : f32
    %173 = vector.broadcast %cst_103 : f32 to vector<32x16xf32>
    %174 = arith.mulf %173, %172 : vector<32x16xf32>
    %175 = arith.addf %171, %174 : vector<32x16xf32>
    %176 = vector.broadcast %55 : f32 to vector<32x16xf32>
    %177 = arith.mulf %175, %176 : vector<32x16xf32>
    %178 = math.sqrt %177 : vector<32x16xf32>
    %cst_104 = arith.constant 9.99999993E-9 : f32
    %179 = vector.broadcast %cst_104 : f32 to vector<32x16xf32>
    %180 = arith.addf %178, %179 : vector<32x16xf32>
    %cst_105 = arith.constant 1.000000e+00 : f32
    %181 = vector.broadcast %cst_105 : f32 to vector<32x16xf32>
    %182 = arith.divf %181, %180 : vector<32x16xf32>
    %cst_106 = arith.constant 0.949999988 : f32
    %183 = vector.broadcast %cst_106 : f32 to vector<32x16xf32>
    %184 = arith.mulf %183, %156 : vector<32x16xf32>
    %185 = arith.mulf %57, %54 : f32
    %186 = arith.mulf %169, %182 : vector<32x16xf32>
    %187 = vector.broadcast %185 : f32 to vector<32x16xf32>
    %188 = arith.mulf %187, %186 : vector<32x16xf32>
    %189 = arith.subf %184, %188 : vector<32x16xf32>
    %190 = vector.broadcast %60 : f32 to vector<32x16xf32>
    %191 = arith.mulf %190, %182 : vector<32x16xf32>
    %192 = arith.mulf %191, %157 : vector<32x16xf32>
    %193 = arith.addf %189, %192 : vector<32x16xf32>
    %194 = arith.addf %153, %193 : vector<32x16xf32>
    %c0_107 = arith.constant 0 : index
    %c0_108 = arith.constant 0 : index
    %195 = vector.load %arg31[%c0_107, %c0_108] : memref<32x16xf32, #tpu.memory_space<vmem>>, vector<32x16xf32>
    tpu.vector_store %arg31[%c0_107, %c0_108], %194 {strides = array<i32>} : memref<32x16xf32, #tpu.memory_space<vmem>>, vector<32x16xf32>,
    %c0_109 = arith.constant 0 : index
    %c0_110 = arith.constant 0 : index
    %196 = vector.load %arg35[%c0_109, %c0_110] : memref<32x16xf32, #tpu.memory_space<vmem>>, vector<32x16xf32>
    tpu.vector_store %arg35[%c0_109, %c0_110], %169 {strides = array<i32>} : memref<32x16xf32, #tpu.memory_space<vmem>>, vector<32x16xf32>,
    %c0_111 = arith.constant 0 : index
    %c0_112 = arith.constant 0 : index
    %197 = vector.load %arg39[%c0_111, %c0_112] : memref<32x16xf32, #tpu.memory_space<vmem>>, vector<32x16xf32>
    tpu.vector_store %arg39[%c0_111, %c0_112], %175 {strides = array<i32>} : memref<32x16xf32, #tpu.memory_space<vmem>>, vector<32x16xf32>,
    %c0_113 = arith.constant 0 : index
    %c0_114 = arith.constant 0 : index
    %198 = vector.load %arg43[%c0_113, %c0_114] : memref<32x16xf32, #tpu.memory_space<vmem>>, vector<32x16xf32>
    tpu.vector_store %arg43[%c0_113, %c0_114], %193 {strides = array<i32>} : memref<32x16xf32, #tpu.memory_space<vmem>>, vector<32x16xf32>,
    %c0_115 = arith.constant 0 : index
    %c0_116 = arith.constant 0 : index
    %199 = vector.load %arg6[%c0_115, %c0_116] : memref<1x16xf32, #tpu.memory_space<vmem>>, vector<1x16xf32>
    %c0_117 = arith.constant 0 : index
    %c0_118 = arith.constant 0 : index
    %200 = vector.load %arg14[%c0_117, %c0_118] : memref<1x16xf32, #tpu.memory_space<vmem>>, vector<1x16xf32>
    %c0_119 = arith.constant 0 : index
    %c0_120 = arith.constant 0 : index
    %201 = vector.load %arg18[%c0_119, %c0_120] : memref<1x16xf32, #tpu.memory_space<vmem>>, vector<1x16xf32>
    %c0_121 = arith.constant 0 : index
    %c0_122 = arith.constant 0 : index
    %202 = vector.load %arg22[%c0_121, %c0_122] : memref<1x16xf32, #tpu.memory_space<vmem>>, vector<1x16xf32>
    %c0_123 = arith.constant 0 : index
    %c0_124 = arith.constant 0 : index
    %203 = vector.load %arg26[%c0_123, %c0_124] : memref<1x16xf32, #tpu.memory_space<vmem>>, vector<1x16xf32>
    %cst_125 = arith.constant 1.000000e+00 : f32
    %204 = vector.broadcast %cst_125 : f32 to vector<1x16xf32>
    %205 = arith.mulf %45, %204 : vector<1x16xf32>
    %c0_126 = arith.constant 0 : index
    %c0_127 = arith.constant 0 : index
    %206 = vector.load %arg10[%c0_126, %c0_127] : memref<1x16xf32, #tpu.memory_space<vmem>>, vector<1x16xf32>
    %207 = arith.subf %199, %206 : vector<1x16xf32>
    %208 = vector.broadcast %58 : f32 to vector<1x16xf32>
    %209 = arith.mulf %208, %207 : vector<1x16xf32>
    %210 = arith.addf %205, %209 : vector<1x16xf32>
    %cst_128 = arith.constant 0.899999976 : f32
    %211 = vector.broadcast %cst_128 : f32 to vector<1x16xf32>
    %212 = arith.mulf %211, %200 : vector<1x16xf32>
    %cst_129 = arith.constant 1.000000e-01 : f32
    %213 = vector.broadcast %cst_129 : f32 to vector<1x16xf32>
    %214 = arith.mulf %213, %210 : vector<1x16xf32>
    %215 = arith.addf %212, %214 : vector<1x16xf32>
    %cst_130 = arith.constant 9.990000e-01 : f32
    %216 = vector.broadcast %cst_130 : f32 to vector<1x16xf32>
    %217 = arith.mulf %216, %201 : vector<1x16xf32>
    %218 = arith.mulf %210, %210 : vector<1x16xf32>
    %cst_131 = arith.constant 1.000000e-03 : f32
    %219 = vector.broadcast %cst_131 : f32 to vector<1x16xf32>
    %220 = arith.mulf %219, %218 : vector<1x16xf32>
    %221 = arith.addf %217, %220 : vector<1x16xf32>
    %222 = vector.broadcast %55 : f32 to vector<1x16xf32>
    %223 = arith.mulf %221, %222 : vector<1x16xf32>
    %224 = math.sqrt %223 : vector<1x16xf32>
    %cst_132 = arith.constant 9.99999993E-9 : f32
    %225 = vector.broadcast %cst_132 : f32 to vector<1x16xf32>
    %226 = arith.addf %224, %225 : vector<1x16xf32>
    %cst_133 = arith.constant 1.000000e+00 : f32
    %227 = vector.broadcast %cst_133 : f32 to vector<1x16xf32>
    %228 = arith.divf %227, %226 : vector<1x16xf32>
    %cst_134 = arith.constant 0.949999988 : f32
    %229 = vector.broadcast %cst_134 : f32 to vector<1x16xf32>
    %230 = arith.mulf %229, %202 : vector<1x16xf32>
    %231 = arith.mulf %57, %54 : f32
    %232 = arith.mulf %215, %228 : vector<1x16xf32>
    %233 = vector.broadcast %231 : f32 to vector<1x16xf32>
    %234 = arith.mulf %233, %232 : vector<1x16xf32>
    %235 = arith.subf %230, %234 : vector<1x16xf32>
    %236 = vector.broadcast %60 : f32 to vector<1x16xf32>
    %237 = arith.mulf %236, %228 : vector<1x16xf32>
    %238 = arith.mulf %237, %203 : vector<1x16xf32>
    %239 = arith.addf %235, %238 : vector<1x16xf32>
    %240 = arith.addf %199, %239 : vector<1x16xf32>
    %c0_135 = arith.constant 0 : index
    %c0_136 = arith.constant 0 : index
    %241 = vector.load %arg32[%c0_135, %c0_136] : memref<1x16xf32, #tpu.memory_space<vmem>>, vector<1x16xf32>
    tpu.vector_store %arg32[%c0_135, %c0_136], %240 {strides = array<i32>} : memref<1x16xf32, #tpu.memory_space<vmem>>, vector<1x16xf32>,
    %c0_137 = arith.constant 0 : index
    %c0_138 = arith.constant 0 : index
    %242 = vector.load %arg36[%c0_137, %c0_138] : memref<1x16xf32, #tpu.memory_space<vmem>>, vector<1x16xf32>
    tpu.vector_store %arg36[%c0_137, %c0_138], %215 {strides = array<i32>} : memref<1x16xf32, #tpu.memory_space<vmem>>, vector<1x16xf32>,
    %c0_139 = arith.constant 0 : index
    %c0_140 = arith.constant 0 : index
    %243 = vector.load %arg40[%c0_139, %c0_140] : memref<1x16xf32, #tpu.memory_space<vmem>>, vector<1x16xf32>
    tpu.vector_store %arg40[%c0_139, %c0_140], %221 {strides = array<i32>} : memref<1x16xf32, #tpu.memory_space<vmem>>, vector<1x16xf32>,
    %c0_141 = arith.constant 0 : index
    %c0_142 = arith.constant 0 : index
    %244 = vector.load %arg44[%c0_141, %c0_142] : memref<1x16xf32, #tpu.memory_space<vmem>>, vector<1x16xf32>
    tpu.vector_store %arg44[%c0_141, %c0_142], %239 {strides = array<i32>} : memref<1x16xf32, #tpu.memory_space<vmem>>, vector<1x16xf32>,
    return
  }
}

</mosaic_0001>

<bundles_post_ra>
// kernel: step.1
= control target key start
LH: loop header
LB: loop body
LE: loop exit
PB: predicated region body
PF: predicated region fallthrough
CT: control target
= control target key end

     0   :  { %s1554_s6 = smov 1   ;;  %s1555_s10 = smov 2   ;;  %s2239_s0 = inlined_call_operand.smem [shape: u32[45], index: -1, kind: input, shape index: {}] }
   0x1   :  { %s1613_s5 = sld [smem:[%s2239_s0]]   ;;  %s1556_s14 = smov 3  }
   0x2   :  { %s1618_s9 = sld [smem:[%s2239_s0 + %s1554_s6]]   ;;  %s1557_s18 = smov 4  }
   0x3   :  { %s1623_s13 = sld [smem:[%s2239_s0 + %s1555_s10]]   ;;  %s1558_s22 = smov 5  }
   0x4   :  { %s1628_s17 = sld [smem:[%s2239_s0 + %s1556_s14]]   ;;  %s1559_s26 = smov 6  }
   0x5   :  { %s1633_s21 = sld [smem:[%s2239_s0 + %s1557_s18]]   ;;  %s1560_s30 = smov 7  }
   0x6   :  { %s1638_s25 = sld [smem:[%s2239_s0 + %s1558_s22]]   ;;  %s1561_s4 = smov 8  }
   0x7   :  { %s1643_s29 = sld [smem:[%s2239_s0 + %s1559_s26]]   ;;  %s1562_s10 = smov 9  }
   0x8   :  { %s1648_s3 = sld [smem:[%s2239_s0 + %s1560_s30]]   ;;  %s1563_s15 = smov 10  }
   0x9   :  { %s1653_s8 = sld [smem:[%s2239_s0 + %s1561_s4]]   ;;  %s1564_s20 = smov 11  }
   0xa   :  { %s1658_s14 = sld [smem:[%s2239_s0 + %s1562_s10]]   ;;  %s1565_s26 = smov 12  }
   0xb   :  { %s1663_s19 = sld [smem:[%s2239_s0 + %s1563_s15]]   ;;  %s1566_s1 = smov 13  }
   0xc   :  { %s1668_s24 = sld [smem:[%s2239_s0 + %s1564_s20]]   ;;  %s1567_s7 = smov 14  }
   0xd   :  { %s1673_s30 = sld [smem:[%s2239_s0 + %s1565_s26]]   ;;  %s1568_s15 = smov 15  }
   0xe   :  { %2258 = sst [smem:[#allocation11_spill]] %s1648_s3  ;;  %s1569_s22 = smov 16  }
   0xf   :  { %2259 = sst [smem:[#allocation12_spill]] %s1653_s8  ;;  %s1570_s28 = smov 17  }
  0x10   :  { %2260 = sst [smem:[#allocation13_spill]] %s1658_s14 }
  0x11   :  { %s1678_s6 = sld [smem:[%s2239_s0 + %s1566_s1]]  }
  0x12   :  { %2261 = sst [smem:[#allocation14_spill]] %s1668_s24 }
  0x13   :  { %2262 = sst [smem:[#allocation15_spill]] %s1673_s30 }
  0x14   :  { %s1683_s12 = sld [smem:[%s2239_s0 + %s1567_s7]]   ;;  %s1571_s7 = smov 18  }
  0x15   :  { %s1688_s20 = sld [smem:[%s2239_s0 + %s1568_s15]]   ;;  %s1572_s15 = smov 19  }
  0x16   :  { %s1693_s27 = sld [smem:[%s2239_s0 + %s1569_s22]]   ;;  %s1573_s22 = smov 20  }
  0x17   :  { %2263 = sst [smem:[#allocation16_spill]] %s1678_s6 }
  0x18   :  { %s1698_s4 = sld [smem:[%s2239_s0 + %s1570_s28]]   ;;  %s1574_s28 = smov 21  }
  0x19   :  { %s1703_s6 = sld [smem:[%s2239_s0 + %s1571_s7]]   ;;  %s1575_s7 = smov 22  }
  0x1a   :  { %s1713_s14 = sld [smem:[%s2239_s0 + %s1573_s22]]   ;;  %s1577_s22 = smov 24  }
  0x1b   :  { %2264 = sst [smem:[#allocation17_spill]] %s1688_s20 }
  0x1c   :  { %2265 = sst [smem:[#allocation18_spill]] %s1693_s27 }
  0x1d   :  { %s1708_s20 = sld [smem:[%s2239_s0 + %s1572_s15]]   ;;  %s1576_s15 = smov 23  }
  0x1e   :  { %2266 = sst [smem:[#allocation19_spill]] %s1698_s4 }
  0x1f   :  { %s1718_s4 = sld [smem:[%s2239_s0 + %s1574_s28]]   ;;  %s1578_s28 = smov 25  }
  0x20   :  { %2268 = sst [smem:[#allocation21_spill]] %s1713_s14 }
  0x21   :  { %s1723_s24 = sld [smem:[%s2239_s0 + %s1575_s7]]   ;;  %s1579_s7 = smov 26  }
  0x22   :  { %s1733_s3 = sld [smem:[%s2239_s0 + %s1577_s22]]   ;;  %s1581_s22 = smov 28  }
  0x23   :  { %2267 = sst [smem:[#allocation20_spill]] %s1708_s20 }
  0x24   :  { %s1728_s20 = sld [smem:[%s2239_s0 + %s1576_s15]]   ;;  %s1580_s15 = smov 27  }
  0x25   :  { %2269 = sst [smem:[#allocation22_spill]] %s1718_s4 }
  0x26   :  { %s1738_s4 = sld [smem:[%s2239_s0 + %s1578_s28]]   ;;  %s1582_s28 = smov 29  }
  0x27   :  { %s1743_s14 = sld [smem:[%s2239_s0 + %s1579_s7]]   ;;  %s1583_s7 = smov 30  }
  0x28   :  { %2271 = sst [smem:[#allocation24_spill]] %s1733_s3 }
  0x29   :  { %s1753_s3 = sld [smem:[%s2239_s0 + %s1581_s22]]   ;;  %s1585_s22 = smov 32  }
  0x2a   :  { %2270 = sst [smem:[#allocation23_spill]] %s1728_s20 }
  0x2b   :  { %s1748_s20 = sld [smem:[%s2239_s0 + %s1580_s15]]   ;;  %s1584_s15 = smov 31  }
  0x2c   :  { %2272 = sst [smem:[#allocation25_spill]] %s1738_s4 }
  0x2d   :  { %s1758_s4 = sld [smem:[%s2239_s0 + %s1582_s28]]   ;;  %s1586_s28 = smov 33  }
  0x2e   :  { %s1763_s27 = sld [smem:[%s2239_s0 + %s1583_s7]]   ;;  %s1587_s7 = smov 34  }
  0x2f   :  { %2274 = sst [smem:[#allocation27_spill]] %s1753_s3 }
  0x30   :  { %s1773_s3 = sld [smem:[%s2239_s0 + %s1585_s22]]   ;;  %s1589_s22 = smov 36  }
  0x31   :  { %2273 = sst [smem:[#allocation26_spill]] %s1748_s20 }
  0x32   :  { %s1768_s20 = sld [smem:[%s2239_s0 + %s1584_s15]]   ;;  %s1588_s15 = smov 35  }
  0x33   :  { %2275 = sst [smem:[#allocation28_spill]] %s1758_s4 }
  0x34   :  { %2276 = sst [smem:[#allocation29_spill]] %s1763_s27 }
  0x35   :  { %s1778_s4 = sld [smem:[%s2239_s0 + %s1586_s28]]   ;;  %s1590_s28 = smov 37  }
  0x36   :  { %2278 = sst [smem:[#allocation31_spill]] %s1773_s3 }
  0x37   :  { %s1783_s27 = sld [smem:[%s2239_s0 + %s1587_s7]]   ;;  %s1591_s7 = smov 38  }
  0x38   :  { %2277 = sst [smem:[#allocation30_spill]] %s1768_s20 }
  0x39   :  { %s1788_s20 = sld [smem:[%s2239_s0 + %s1588_s15]]   ;;  %s1592_s15 = smov 39  }
  0x3a   :  { %s1793_s30 = sld [smem:[%s2239_s0 + %s1589_s22]]   ;;  %s1593_s22 = smov 40  }
  0x3b   :  { %2279 = sst [smem:[#allocation32_spill]] %s1778_s4 }
  0x3c   :  { %s1798_s4 = sld [smem:[%s2239_s0 + %s1590_s28]]   ;;  %s1594_s28 = smov 41  }
  0x3d   :  { %2280 = sst [smem:[#allocation33_spill]] %s1783_s27 }
  0x3e   :  { %s1803_s27 = sld [smem:[%s2239_s0 + %s1591_s7]]   ;;  %s1595_s7 = smov 42  }
  0x3f   :  { %2281 = sst [smem:[#allocation34_spill]] %s1788_s20 }
  0x40   :  { %s1808_s20 = sld [smem:[%s2239_s0 + %s1592_s15]]   ;;  %s1596_s15 = smov 43  }
  0x41   :  { %s1813_s8 = sld [smem:[%s2239_s0 + %s1593_s22]]   ;;  %s1597_s22 = smov 44  }
  0x42   :  { %2282 = sst [smem:[#allocation35_spill]] %s1798_s4 }
  0x43   :  { %s1818_s4 = sld [smem:[%s2239_s0 + %s1594_s28]]  }
  0x44   :  { %2283 = sst [smem:[#allocation36_spill]] %s1803_s27 }
  0x45   :  { %s1823_s27 = sld [smem:[%s2239_s0 + %s1595_s7]]  }
  0x46   :  { %2284 = sst [smem:[#allocation37_spill]] %s1808_s20 }
  0x47   :  { %s1828_s20 = sld [smem:[%s2239_s0 + %s1596_s15]]  }
  0x48   :  { %s1833_s3 = sld [smem:[%s2239_s0 + %s1597_s22]]  }
  0x49   :  { %95 = vsyncpa [#allocation4], 0 }
  0x4a   :  { %96 = vsyncpa [#allocation3], 0 }
  0x4b   :  { %97 = vsyncpa [#allocation7], 0  ;;  %s104_s28 = sshll.u32 %s1613_s5, 4  ;;  %s105_s28 = int_to_ptr.vmem [resolvable:$true] %s104_s28 }
  0x4c   :  { %s1492_s1 = scalar_lea.vmem %s105_s28, 16  ;;  %p1497_p1 = scmp.lt.s32.totalorder %s105_s28, %s105_s28 }
  0x4d   :  { %p1493_p0 = scmp.ne.s32.totalorder %s105_s28, %s1492_s1  ;;  %p1498_p2 = scmp.lt.s32.totalorder %s1492_s1, %s1492_s1 }
  0x4f   :  { %p1499_p3 = por %p1498_p2, %p1497_p1 }
  0x51   :  { %p1500_p4 = pnand %p1499_p3, %p1493_p0 }
  0x53   :  { %1503 = shalt.err (!%p1500_p4)
}
  0x54   :  { %s1598_s2 = smov [#allocation2]  }
  0x55   :  { %107 = dma.vmem_to_smem %s105_s28, 16, %s1598_s2, [#allocation4]  }
  0x56   :  { %1548 = dma.done.wait [#allocation4], 16  }
  0x57   :  { %1549 = vsyncadd [#allocation4], 4294967280 }
  0x58   :  { %163 = sfence }
  0x59   :  { %v1837_v0 = vld [vmem:[%s1628_s17] sm:$0xff]  ;;  %v1840_v1 = vld [vmem:[%s1628_s17 + $0x8] sm:$0xff]  ;;  %v1843_v2 = vld [vmem:[%s1628_s17 + $0x10] sm:$0xff]  ;;  %v1599_v3 = vmov 0.0|0.0   ;;  %vm1600_vm0 = vmmov 0   ;;  %v1601_v6 = vmov 0.0   ;;  %v338_v22 = vlaneseq }
  0x5a   :  { %1371 = vmatprep.subr.bf16.mxu0 %v1599_v3  ;;  %v1372_v4 = vpack.c.bf16 %v1840_v1, %v1837_v0  ;;  %v1849_v5 = vld [vmem:[%s1628_s17 + $0x18] sm:$0xff]  ;;  %1330 = vmatprep.mubr.msk.f32.mxu0 %vm1600_vm0, %v1601_v6  ;;  %v1853_v7 = vld [vmem:[%s1638_s25] sm:$0xff]  ;;  %v1857_v8 = vld [vmem:[%s1638_s25 + $0x8] sm:$0xff]  ;;  %vm182_vm1 = vcmask 261120   ;;  %v1602_v16 = vmov 0   ;;  %vm336_vm3 = vcmask 130048  }
  0x5b   :  { %1377 = vmatprep.subr.bf16.mxu1 %v1599_v3  ;;  %1341 = vmatprep.mubr.msk.f32.mxu1 %vm1600_vm0, %v1601_v6  ;;  %v1375_v9 = vpack.c.bf16 %v1849_v5, %v1843_v2  ;;  %v1378_v10 = vpack.c.bf16 %v1857_v8, %v1853_v7  ;;  %v164_v11 = vld [vmem:[%s1618_s9] sm:$0xff]  ;;  %v1871_v12 = vld [vmem:[%s1638_s25 + $0x10] sm:$0xff]  ;;  %v1874_v13 = vld [vmem:[%s1638_s25 + $0x18] sm:$0xff]  ;;  %v339_v23 = vand.u32 127, %v338_v22  ;;  %vm549_vm5 = vcmask 64512   ;;  %s1285_s0 = sld [smem:[#allocation2 + $0x4]] }
  0x5c   :  { %1373 = vmatpush3.bf16.msra.mxu0 %v1372_v4  ;;  %v1381_v14 = vpack.c.bf16 %v1874_v13, %v1871_v12  ;;  %v165_v15 = vld [vmem:[%s1623_s13] sm:$0xff]  ;;  %1442 = vset.pattern.permute.xlu1 %v1602_v16  ;;  %vm1385_vm4 = vmpackc.low %vm336_vm3, %vm336_vm3  ;;  %s1282_s5 = sld [smem:[#allocation2 + $0x1]]  ;;  %vm370_vm6 = vcmask 0   ;;  %vm1130_vm7 = vcmask 122880   ;;  %s1919_s9 = sld [smem:[#allocation2]]  ;;  %vm806_vm11 = vcmask 253952  }
  0x5d   :  { %1374 = vmatprep.subr.bf16.mxu0 %v1599_v3  ;;  %1379 = vmatpush3.bf16.msra.mxu1 %v1378_v10  ;;  %v1272_v17 = vld [vmem:[%s1633_s21] ss:$0 sm:$0xff]  ;;  %s1284_s13 = sld [smem:[#allocation2 + $0x3]]  ;;  %s1287_s17 = sld [smem:[#allocation2 + $0x6]] }
  0x5e   :  { %1380 = vmatprep.subr.bf16.mxu1 %v1599_v3  ;;  %341 = vperm.xlu1 %1442, %v165_v15   ;;  %v1274_v25 = vld [vmem:[%s1643_s29] ss:$0 sm:$0xff]  ;;  %s1286_s7 = sld [smem:[#allocation2 + $0x5]]  ;;  %s2293_s10 = sld [smem:[#allocation29_spill]] }
  0x5f   :  { %v1095_v56 = vld [vmem:[%s1643_s29] sm:$0x1]  ;;  %s2285_s29 = sld [smem:[#allocation31_spill]]  ;;  %s1603_s15 = smov [#allocation5]  }
  0x60   :  { %1376 = vmatpush3.bf16.msra.mxu0 %v1375_v9  ;;  %v1100_v57 = vld [vmem:[%s1663_s19] sm:$0x1]  ;;  %s2286_s19 = sld [smem:[#allocation12_spill]]  ;;  %s1141_s16 = sshll.u32 %s1603_s15, 4  ;;  %s1142_s16 = int_to_ptr.vmem [resolvable:$true] %s1141_s16 }
  0x61   :  { %1383 = vmatprep.subr.bf16.mxu0 %v1599_v3  ;;  %1382 = vmatpush3.bf16.msra.mxu1 %v1381_v14  ;;  %v1101_v61 = vsub.f32 %v1095_v56, %v1100_v57  ;;  %v1907_v63 = vstv %s1285_s0  ;;  %s1604_s18 = smov [#allocation6]   ;;  %s1504_s23 = scalar_lea.vmem %s1142_s16, 16 }
  0x62   :  { %s1151_s22 = sshll.u32 %s1604_s18, 4  ;;  %p1505_p5 = scmp.ne.s32.totalorder %s1142_s16, %s1504_s23  ;;  %s1152_s22 = int_to_ptr.vmem [resolvable:$true] %s1151_s22 }
  0x63   :  { %1331 = vmatmul.mubr.msk.f32.vlgmr.msra.gmra.mrb[0].mxu0 %vm182_vm1, %v164_v11  ;;  %v1102_v9 = vmul.f32 %v1101_v61, %v1907_v63  ;;  %s1508_s26 = scalar_lea.vmem %s1142_s16, 32  ;;  %p1509_p6 = scmp.lt.s32.totalorder %s1142_s16, %s1142_s16 }
  0x64   :  { %1352 = vmatprep.mubr.msk.f32.mxu0 %vm1600_vm0, %v1601_v6  ;;  %p1510_p7 = scmp.lt.s32.totalorder %s1508_s26, %s1504_s23 }
  0x66   :  { %p1511_p8 = por %p1510_p7, %p1509_p6 }
  0x68   :  { %p1512_p9 = pnand %p1511_p8, %p1505_p5 }
  0x69   :  { %1386 = vmatpush3.bf16.xpose.msk.msra.mxu0 %vm1385_vm4, %v1378_v10 }
  0x6a   :  { %1387 = vmatprep.subr.bf16.mxu0 %v1599_v3 }
  0x71   :  { %1390 = vmatpush3.bf16.xpose.msk.msra.mxu0 %vm1385_vm4, %v1381_v14 }
  0x87   :  { %517 = vxpose.xlu1.b32.start.end [1/1] (short) (narrow) %v164_v11, 32  ;;  %v1096_v11 = vld [vmem:[%s1683_s12] sm:$0x1]  ;;  %s1283_s12 = sld [smem:[#allocation2 + $0x2]] }
  0x8d   :  { %s724_s11 = smul.f32 %s1283_s12, %s1919_s9 }
  0xdd   :  { %v342_v24 = vpop.permute.xlu1 %341 }
  0xde   :  { %vm343_vm2 = vcmp.eq.s32.totalorder %v339_v23, %v342_v24 }
  0xdf   :  { %v1276_v26 = vsel %vm343_vm2, 1.0, %v1601_v6 }
 0x107   :  { %v533_v38 = vpop.trf.xlu1 }
 0x10b   :  { %v1893_v39 = vpop.trf.xlu1 }
 0x10f   :  { %v1895_v41 = vpop.trf.xlu1 }
 0x113   :  { %v1897_v42 = vpop.trf.xlu1 }
 0x136   :  { %v252_v18 = vpop.f32.mrb[0].mxu0 }
 0x137   :  { %v1880_v19 = vadd.f32 %v1272_v17, %v252_v18  ;;  %v1332_v20 = vpop.f32.mrb[1].mxu0  ;;  %v1104_v18 = vmul.f32 0.9, %v1096_v11 }
 0x139   :  { %v256_v21 = vmax.f32 %v1880_v19, 0.0  ;;  %vm468_vm10 = vcmp.gt.f32.partialorder %v1880_v19, 0.0 }
 0x13b   :  { %1342 = vmatmul.mubr.msk.f32.vlgmr.msra.gmra.mrb[0].mxu1 %vm182_vm1, %v256_v21 }
 0x13c   :  { %1357 = vmatprep.mubr.msk.f32.mxu1 %vm549_vm5, %v533_v38 }
 0x20e   :  { %v332_v27 = vpop.f32.mrb[0].mxu1 }
 0x20f   :  { %v333_v28 = vadd.f32 %v1274_v25, %v332_v27  ;;  %v1343_v29 = vpop.f32.mrb[1].mxu1  ;;  %v1912_v25 = vstv %s1282_s5 }
 0x211   :  { %v346_v30 = vsel %vm336_vm3, %v333_v28, -inf  ;;  %337 = vst.msk [vmem:[#allocation6] sm:$0xff] %vm336_vm3, %v333_v28  ;;  %v358_v31 = vmul.f32 %v1276_v26, %v333_v28 }
 0x212   :  { %347 = vmax.xlane.f32.xlu0 %v346_v30 }
 0x213   :  { %v359_v32 = vsel %vm336_vm3, %v358_v31, 0.0 }
 0x214   :  { %360 = vadd.xlane.f32.xlu1 %v359_v32 }
 0x29f   :  { %v348_v33 = vpop.xlane.xlu0 %347 }
 0x2a0   :  { %v349_v34 = vsub.f32 %v333_v28, %v348_v33 }
 0x2a1   :  { %v361_v48 = vpop.xlane.xlu1 %360 }
 0x2a2   :  { %v350_v35 = vmul.f32 1.442695, %v349_v34  ;;  %v1922_v34 = vstv %s1287_s17 }
 0x2a4   :  { %1444 = vpow2.f32 %v350_v35  ;;  %v1098_v35 = vld [vmem:[%s1723_s24] sm:$0x1]  ;;  %s2290_s24 = sld [smem:[#allocation36_spill]] }
 0x2a5   :  { %v1122_v38 = vmul.f32 0.95, %v1098_v35 }
 0x2ae   :  { %v1445_v36 = vpop.eup %1444 }
 0x2af   :  { %v352_v37 = vsel %vm336_vm3, %v1445_v36, 0.0 }
 0x2b0   :  { %353 = vadd.xlane.f32.xlu0 %v352_v37 }
 0x2dd   :  { %843 = vxpose.xlu0.b32.start.end [1/1] (short) (narrow) %v256_v21, 32 }
 0x306   :  { %1443 = vset.pattern.permute.xlu0 %v1602_v16  ;;  %v1097_v16 = vld [vmem:[%s1703_s6] sm:$0x1]  ;;  %s2292_s6 = sld [smem:[#allocation24_spill]] }
 0x307   :  { %v1107_v20 = vmul.f32 0.999, %v1097_v16 }
 0x33d   :  { %v354_v40 = vpop.xlane.xlu0 %353 }
 0x33e   :  { %1446 = vlog2.f32 %v354_v40 }
 0x33f   :  { %1448 = vrcp.f32 %v354_v40 }
 0x348   :  { %v1447_v43 = vpop.eup %1446 }
 0x349   :  { %v1449_v44 = vpop.eup %1448  ;;  %v356_v45 = vmul.f32 0.6931472, %v1447_v43 }
 0x34a   :  { %v373_v46 = vmul.f32 %v1449_v44, %v1445_v36  ;;  %v1099_v44 = vld [vmem:[%s1743_s14] sm:$0x1]  ;;  %s2287_s14 = sld [smem:[#allocation15_spill]] }
 0x34b   :  { %v357_v47 = vadd.f32 %v356_v45, %v348_v33 }
 0x34c   :  { %v374_v49 = vsub.f32 %v373_v46, %v1276_v26 }
 0x34d   :  { %v362_v50 = vsub.f32 %v357_v47, %v361_v48 }
 0x34e   :  { %v1899_v51 = vmul.f32 0.125, %v374_v49 }
 0x34f   :  { %v363_v52 = vrot.slane %v362_v50, 4 }
 0x350   :  { %v376_v53 = vsel %vm336_vm3, %v1899_v51, 0.0  ;;  %1353 = vmatmul.mubr.msk.f32.vlgmr.msra.gmra.mrb[2].mxu0 %vm336_vm3, %v1899_v51 }
 0x351   :  { %v377_v54 = vrot.slane %v376_v53, 4  ;;  %v364_v55 = vadd.f32 %v363_v52, %v362_v50 }
 0x353   :  { %v378_v58 = vadd.f32 %v377_v54, %v376_v53  ;;  %v365_v59 = vrot.slane %v364_v55, 2 }
 0x355   :  { %v379_v60 = vrot.slane %v378_v58, 2  ;;  %v366_v62 = vadd.f32 %v365_v59, %v364_v55  ;;  %v776_v59 = vld [vmem:[%s2286_s19] sm:$0x1] }
 0x357   :  { %v380_v3 = vadd.f32 %v379_v60, %v378_v58  ;;  %v367_v4 = vrot.slane %v366_v62, 1 }
 0x359   :  { %v381_v6 = vrot.slane %v380_v3, 1  ;;  %v368_v10 = vadd.f32 %v367_v4, %v366_v62 }
 0x35b   :  { %v382_v14 = vadd.f32 %v381_v6, %v380_v3  ;;  %v369_v15 = vmul.f32 0.125, %v368_v10 }
 0x35d   :  { %v1103_v17 = vadd.f32 %v1102_v9, %v382_v14  ;;  %371 = vst.msk [vmem:[#allocation5] sm:$0x1] %vm370_vm6, %v369_v15  ;;  %v859_v50 = vpop.trf.xlu0 }
 0x35f   :  { %v1108_v21 = vmul.f32 %v1103_v17, %v1103_v17  ;;  %v1105_v22 = vmul.f32 0.1, %v1103_v17 }
 0x361   :  { %v1109_v23 = vmul.f32 0.001, %v1108_v21  ;;  %v1106_v24 = vadd.f32 %v1105_v22, %v1104_v18  ;;  %v860_v53 = vpop.trf.xlu0 }
 0x363   :  { %v1110_v26 = vadd.f32 %v1109_v23, %v1107_v20  ;;  %1132 = vst.msk [vmem:[%s1793_s30] sm:$0x1] %vm1130_vm7, %v1106_v24  ;;  %s2291_s30 = sld [smem:[#allocation21_spill]] }
 0x365   :  { %v1111_v27 = vmul.f32 %v1110_v26, %v1912_v25  ;;  %1133 = vst.msk [vmem:[%s1813_s8] sm:$0x1] %vm1130_vm7, %v1110_v26  ;;  %s1048_s8 = smul.f32 %s1284_s13, %s1919_s9  ;;  %v861_v60 = vpop.trf.xlu0 }
 0x367   :  { %1450 = vrsqrt.f32 %v1111_v27  ;;  %vm1114_vm8 = vcmp.eq.f32.partialorder %v1111_v27, inf  ;;  %v1117_v30 = vand.u32 2147483648, %v1111_v27  ;;  %vm1116_vm9 = vcmp.eq.f32.partialorder %v1111_v27, 0.0 }
 0x368   :  { %v1925_v37 = vstv %s1048_s8 }
 0x369   :  { %v862_v6 = vpop.trf.xlu0 }
 0x371   :  { %v1451_v28 = vpop.eup %1450 }
 0x372   :  { %v1113_v29 = vmul.f32 %v1451_v28, %v1111_v27  ;;  %v1959_v28 = vstv %s1286_s7 }
 0x374   :  { %v1115_v31 = vsel %vm1114_vm8, %v1111_v27, %v1113_v29  ;;  %v774_v29 = vld [vmem:[%s2291_s30] sm:$0x1] }
 0x375   :  { %v1118_v32 = vsel %vm1116_vm9, %v1117_v30, %v1115_v31  ;;  %v1962_v31 = vstv %s724_s11 }
 0x376   :  { %v1119_v33 = vadd.f32 1e-08, %v1118_v32 }
 0x378   :  { %1452 = vrcp.f32 %v1119_v33  ;;  %v798_v33 = vmul.f32 0.95, %v774_v29 }
 0x382   :  { %v1453_v36 = vpop.eup %1452 }
 0x383   :  { %v1123_v40 = vmul.f32 %v1453_v36, %v1106_v24  ;;  %v1126_v43 = vmul.f32 %v1453_v36, %v1922_v34  ;;  %v775_v36 = vld [vmem:[%s2292_s6] sm:$0x1] }
 0x385   :  { %v1124_v45 = vmul.f32 %v1123_v40, %v1925_v37  ;;  %v1127_v47 = vmul.f32 %v1126_v43, %v1099_v44 }
 0x387   :  { %v1125_v46 = vsub.f32 %v1122_v38, %v1124_v45 }
 0x389   :  { %v1128_v48 = vadd.f32 %v1127_v47, %v1125_v46 }
 0x38b   :  { %v1129_v49 = vadd.f32 %v1128_v48, %v1095_v56  ;;  %1134 = vst.msk [vmem:[%s1833_s3] sm:$0x1] %vm1130_vm7, %v1128_v48  ;;  %v771_v56 = vld [vmem:[%s1633_s21] sm:$0x1]  ;;  %s2288_s3 = sld [smem:[#allocation18_spill]]  ;;  %s2289_s21 = sld [smem:[#allocation33_spill]] }
 0x38c   :  { %v777_v62 = vsub.f32 %v771_v56, %v776_v59 }
 0x38d   :  { %1131 = vst.msk [vmem:[%s2285_s29] sm:$0x1] %vm1130_vm7, %v1129_v49 }
 0x38e   :  { %v778_v4 = vmul.f32 %v777_v62, %v1907_v63 }
 0x391   :  { %v773_v9 = vld [vmem:[%s2288_s3] sm:$0x1] }
 0x392   :  { %v783_v14 = vmul.f32 0.999, %v773_v9 }
 0x423   :  { %v464_v52 = vpop.f32.mrb[2].mxu0 }
 0x424   :  { %v469_v54 = vsel %vm468_vm10, %v464_v52, 0.0  ;;  %v1354_v55 = vpop.f32.mrb[3].mxu0  ;;  %1355 = vmatprep.subr.msk.mxu1 %vm468_vm10, %v464_v52 }
 0x425   :  { %v470_v57 = vsel %vm182_vm1, %v469_v54, 0.0  ;;  %1356 = vmatpush3.msk.msra.mxu1 %vm468_vm10, %v464_v52 }
 0x426   :  { %v471_v58 = vrot.slane %v470_v57, 4  ;;  %1358 = vmatmul.mubr.msk.f32.vlgmr.msra.gmra.mrb[2].mxu1 %vm549_vm5, %v1893_v39  ;;  %1363 = vmatprep.subr.mxu1 %v1899_v51 }
 0x427   :  { %1364 = vmatpush3.msra.mxu1 %v1899_v51  ;;  %1360 = vmatprep.mubr.msk.f32.mxu1 %vm549_vm5, %v1895_v41  ;;  %v772_v51 = vld [vmem:[%s2287_s14] sm:$0x1] }
 0x428   :  { %v472_v19 = vadd.f32 %v471_v58, %v470_v57  ;;  %v780_v11 = vmul.f32 0.9, %v772_v51 }
 0x42a   :  { %v473_v61 = vrot.slane %v472_v19, 2  ;;  %1361 = vmatmul.mubr.msk.f32.gmra.mrb[4].mxu1 %vm549_vm5, %v1897_v42 }
 0x42b   :  { %1365 = vmatprep.mubr.msk.f32.mxu1 %vm549_vm5, %v859_v50 }
 0x42c   :  { %v474_v39 = vadd.f32 %v473_v61, %v472_v19 }
 0x42e   :  { %v475_v3 = vrot.slane %v474_v39, 1  ;;  %1366 = vmatmul.mubr.msk.f32.vlgmr.msra.gmra.mrb[6].mxu1 %vm549_vm5, %v860_v53 }
 0x42f   :  { %1368 = vmatprep.mubr.msk.f32.mxu1 %vm549_vm5, %v861_v60 }
 0x430   :  { %v476_v41 = vadd.f32 %v475_v3, %v474_v39 }
 0x432   :  { %v779_v10 = vadd.f32 %v778_v4, %v476_v41  ;;  %1369 = vmatmul.mubr.msk.f32.gmra.mrb[8].mxu1 %vm549_vm5, %v862_v6 }
 0x434   :  { %v781_v42 = vmul.f32 0.1, %v779_v10  ;;  %v784_v15 = vmul.f32 %v779_v10, %v779_v10 }
 0x436   :  { %v782_v16 = vadd.f32 %v781_v42, %v780_v11  ;;  %v785_v17 = vmul.f32 0.001, %v784_v15 }
 0x438   :  { %v786_v18 = vadd.f32 %v785_v17, %v783_v14  ;;  %808 = vst.msk [vmem:[%s2289_s21] sm:$0x1] %vm806_vm11, %v782_v16 }
 0x43a   :  { %v787_v20 = vmul.f32 %v786_v18, %v1912_v25  ;;  %809 = vst.msk [vmem:[%s2290_s24] sm:$0x1] %vm806_vm11, %v786_v18 }
 0x43c   :  { %1454 = vrsqrt.f32 %v787_v20  ;;  %vm790_vm12 = vcmp.eq.f32.partialorder %v787_v20, inf  ;;  %v793_v23 = vand.u32 2147483648, %v787_v20  ;;  %vm792_vm13 = vcmp.eq.f32.partialorder %v787_v20, 0.0 }
 0x446   :  { %v1455_v21 = vpop.eup %1454 }
 0x447   :  { %v789_v22 = vmul.f32 %v1455_v21, %v787_v20 }
 0x449   :  { %v791_v24 = vsel %vm790_vm12, %v787_v20, %v789_v22 }
 0x44a   :  { %v794_v26 = vsel %vm792_vm13, %v793_v23, %v791_v24 }
 0x44b   :  { %v795_v27 = vadd.f32 1e-08, %v794_v26 }
 0x44d   :  { %1456 = vrcp.f32 %v795_v27 }
 0x457   :  { %v1457_v30 = vpop.eup %1456 }
 0x458   :  { %v799_v32 = vmul.f32 %v1457_v30, %v782_v16  ;;  %v802_v35 = vmul.f32 %v1457_v30, %v1959_v28 }
 0x45a   :  { %v800_v38 = vmul.f32 %v799_v32, %v1962_v31  ;;  %v803_v43 = vmul.f32 %v802_v35, %v775_v36 }
 0x45c   :  { %v801_v40 = vsub.f32 %v798_v33, %v800_v38 }
 0x45e   :  { %v804_v44 = vadd.f32 %v803_v43, %v801_v40 }
 0x460   :  { %v805_v45 = vadd.f32 %v804_v44, %v771_v56  ;;  %810 = vst.msk [vmem:[%s1823_s27] sm:$0x1] %vm806_vm11, %v804_v44 }
 0x462   :  { %807 = vst.msk [vmem:[%s2293_s10] sm:$0x1] %vm806_vm11, %v805_v45 }
 0x463   :  { %1515 = shalt.err (!%p1512_p9)
}
 0x464   :  { %s2294_s28 = sld [smem:[#allocation26_spill]] }
 0x46a   :  { %s1516_s27 = scalar_lea.hbm %s2294_s28, 16 }
 0x46b   :  { %p1517_p10 = scmp.ne.s32.totalorder %s2294_s28, %s1516_s27  ;;  %p1520_p11 = scmp.lt.u32.totalorder %s1516_s27, %s2294_s28 }
 0x46d   :  { %p1522_p12 = pnand %p1520_p11, %p1517_p10 }
 0x46f   :  { %1525 = shalt.err (!%p1522_p12)
}
 0x470   :  { %1144 = dma.vmem_to_hbm [thread:$0]  %s1142_s16, 16, %s2294_s28, [#allocation3]  }
 0x471   :  { %s1526_s1 = scalar_lea.vmem %s1152_s22, 128  ;;  %p1531_p0 = scmp.lt.s32.totalorder %s1152_s22, %s1152_s22 }
 0x472   :  { %p1527_p13 = scmp.ne.s32.totalorder %s1152_s22, %s1526_s1  ;;  %p1532_p1 = scmp.lt.s32.totalorder %s1526_s1, %s1526_s1 }
 0x474   :  { %p1533_p2 = por %p1532_p1, %p1531_p0 }
 0x476   :  { %p1534_p3 = pnand %p1533_p2, %p1527_p13 }
 0x478   :  { %1537 = shalt.err (!%p1534_p3)
}
 0x479   :  { %s2295_s2 = sld [smem:[#allocation27_spill]] }
 0x47f   :  { %s1538_s0 = scalar_lea.hbm %s2295_s2, 128 }
 0x480   :  { %p1539_p4 = scmp.ne.s32.totalorder %s2295_s2, %s1538_s0  ;;  %p1542_p5 = scmp.lt.u32.totalorder %s1538_s0, %s2295_s2 }
 0x482   :  { %p1544_p6 = pnand %p1542_p5, %p1539_p4 }
 0x484   :  { %1547 = shalt.err (!%p1544_p6)
}
 0x485   :  { %s2296_s5 = sld [smem:[#allocation11_spill]]  ;;  %s2297_s9 = sld [smem:[#allocation14_spill]] }
 0x486   :  { %s2298_s13 = sld [smem:[#allocation13_spill]]  ;;  %s2299_s17 = sld [smem:[#allocation17_spill]] }
 0x487   :  { %1154 = dma.vmem_to_hbm [thread:$0]  %s1152_s22, 128, %s2295_s2, [#allocation7]  }
 0x488   :  { %s2300_s29 = sld [smem:[#allocation32_spill]]  ;;  %s2302_s19 = sld [smem:[#allocation19_spill]] }
 0x489   :  { %s2301_s8 = sld [smem:[#allocation16_spill]]  ;;  %s2303_s14 = sld [smem:[#allocation35_spill]] }
 0x48a   :  { %s2304_s3 = sld [smem:[#allocation34_spill]]  ;;  %s2305_s21 = sld [smem:[#allocation37_spill]] }
 0x48b   :  { %v505_v46 = vld [vmem:[%s2296_s5 + $0x8] sm:$0xff]  ;;  %v504_v47 = vld [vmem:[%s2296_s5] sm:$0xff]  ;;  %v507_v50 = vld [vmem:[%s2296_s5 + $0x18] sm:$0xff]  ;;  %s2306_s24 = sld [smem:[#allocation20_spill]]  ;;  %s2307_s30 = sld [smem:[#allocation23_spill]] }
 0x48c   :  { %v509_v48 = vsub.f32 %v1840_v1, %v505_v46  ;;  %v508_v49 = vsub.f32 %v1837_v0, %v504_v47  ;;  %v506_v52 = vld [vmem:[%s2296_s5 + $0x10] sm:$0xff]  ;;  %v489_v53 = vld [vmem:[%s2297_s9 + $0x8] sm:$0xff]  ;;  %v488_v58 = vld [vmem:[%s2297_s9] sm:$0xff]  ;;  %v511_v56 = vsub.f32 %v1849_v5, %v507_v50  ;;  %s2308_s6 = sld [smem:[#allocation22_spill]]  ;;  %s2309_s12 = sld [smem:[#allocation28_spill]] }
 0x48d   :  { %v832_v54 = vld [vmem:[%s2298_s13 + $0x8] sm:$0xff]  ;;  %v510_v59 = vsub.f32 %v1843_v2, %v506_v52  ;;  %v492_v19 = vld [vmem:[%s2299_s17] sm:$0xff]  ;;  %v648_v61 = vmul.f32 0.9, %v489_v53  ;;  %v491_v62 = vld [vmem:[%s2297_s9 + $0x18] sm:$0xff]  ;;  %s2310_s7 = sld [smem:[#allocation25_spill]] }
 0x48e   :  { %v493_v55 = vld [vmem:[%s2299_s17 + $0x8] sm:$0xff]  ;;  %v514_v57 = vmul.f32 %v1907_v63, %v509_v48  ;;  %v513_v60 = vmul.f32 %v1907_v63, %v508_v49  ;;  %v495_v39 = vld [vmem:[%s2299_s17 + $0x18] sm:$0xff]  ;;  %v836_v3 = vsub.f32 %v1857_v8, %v832_v54  ;;  %v831_v4 = vld [vmem:[%s2298_s13] sm:$0xff]  ;;  %v647_v41 = vmul.f32 0.9, %v488_v58 }
 0x48f   :  { %v660_v6 = vmul.f32 0.999, %v493_v55  ;;  %v834_v9 = vld [vmem:[%s2298_s13 + $0x18] sm:$0xff]  ;;  %v659_v42 = vmul.f32 0.999, %v492_v19  ;;  %v516_v14 = vmul.f32 %v1907_v63, %v511_v56  ;;  %v490_v15 = vld [vmem:[%s2297_s9 + $0x10] sm:$0xff]  ;;  %v515_v16 = vmul.f32 %v1907_v63, %v510_v59 }
 0x490   :  { %v833_v17 = vld [vmem:[%s2298_s13 + $0x10] sm:$0xff]  ;;  %v650_v20 = vmul.f32 0.9, %v491_v62  ;;  %v662_v21 = vmul.f32 0.999, %v495_v39  ;;  %v835_v8 = vsub.f32 %v1853_v7, %v831_v4  ;;  %v840_v26 = vmul.f32 %v836_v3, %v1907_v63  ;;  %v820_v58 = vld [vmem:[%s2302_s19 + $0x8] sm:$0xff] }
 0x491   :  { %v494_v22 = vld [vmem:[%s2299_s17 + $0x10] sm:$0xff]  ;;  %v838_v27 = vsub.f32 %v1874_v13, %v834_v9  ;;  %v649_v33 = vmul.f32 0.9, %v490_v15  ;;  %v837_v35 = vsub.f32 %v1871_v12, %v833_v17  ;;  %v815_v59 = vld [vmem:[%s2301_s8] sm:$0xff] }
 0x492   :  { %v661_v43 = vmul.f32 0.999, %v494_v22  ;;  %v839_v47 = vmul.f32 %v835_v8, %v1907_v63  ;;  %v819_v3 = vld [vmem:[%s2302_s19] sm:$0xff] }
 0x493   :  { %v842_v52 = vmul.f32 %v838_v27, %v1907_v63  ;;  %v841_v19 = vmul.f32 %v837_v35, %v1907_v63 }
 0x4f9   :  { %v1359_v51 = vpop.f32.mrb[2].mxu1 }
 0x4fa   :  { %v634_v10 = vadd.f32 %v1359_v51, %v514_v57  ;;  %v628_v11 = vpop.f32.mrb[3].mxu1  ;;  %v816_v57 = vld [vmem:[%s2301_s8 + $0x8] sm:$0xff]  ;;  %v818_v51 = vld [vmem:[%s2301_s8 + $0x18] sm:$0xff] }
 0x4fb   :  { %v629_v18 = vadd.f32 %v628_v11, %v513_v60  ;;  %v985_v11 = vmul.f32 0.999, %v820_v58 }
 0x4fc   :  { %v652_v23 = vmul.f32 0.1, %v634_v10  ;;  %v664_v24 = vmul.f32 %v634_v10, %v634_v10  ;;  %v973_v10 = vmul.f32 0.9, %v816_v57 }
 0x4fd   :  { %v651_v29 = vmul.f32 0.1, %v629_v18  ;;  %v663_v30 = vmul.f32 %v629_v18, %v629_v18  ;;  %v1362_v32 = vpop.f32.mrb[4].mxu1 }
 0x4fe   :  { %v2008_v36 = vadd.f32 %v652_v23, %v648_v61  ;;  %v668_v38 = vmul.f32 0.001, %v664_v24  ;;  %v644_v40 = vadd.f32 %v1362_v32, %v516_v14  ;;  %v638_v7 = vpop.f32.mrb[5].mxu1  ;;  %v984_v14 = vmul.f32 0.999, %v819_v3 }
 0x4ff   :  { %v2010_v44 = vadd.f32 %v651_v29, %v647_v41  ;;  %v667_v45 = vmul.f32 0.001, %v663_v30  ;;  %v639_v46 = vadd.f32 %v638_v7, %v515_v16  ;;  %v975_v16 = vmul.f32 0.9, %v818_v51  ;;  %v817_v29 = vld [vmem:[%s2301_s8 + $0x10] sm:$0xff] }
 0x500   :  { %v672_v48 = vadd.f32 %v668_v38, %v660_v6  ;;  %v654_v49 = vmul.f32 0.1, %v644_v40  ;;  %v666_v50 = vmul.f32 %v644_v40, %v644_v40  ;;  %760 = vst.msk [vmem:[%s2300_s29 + $0x8] sm:$0xff] %vm182_vm1, %v2008_v36 }
 0x501   :  { %v671_v53 = vadd.f32 %v667_v45, %v659_v42  ;;  %v653_v54 = vmul.f32 0.1, %v639_v46  ;;  %v665_v55 = vmul.f32 %v639_v46, %v639_v46  ;;  %759 = vst.msk [vmem:[%s2300_s29] sm:$0xff] %vm182_vm1, %v2010_v44  ;;  %v1367_v56 = vpop.f32.mrb[6].mxu1  ;;  %v972_v42 = vmul.f32 0.9, %v815_v59 }
 0x502   :  { %v2025_v60 = vmul.f32 %v1912_v25, %v672_v48  ;;  %v2027_v61 = vadd.f32 %v654_v49, %v650_v20  ;;  %v670_v62 = vmul.f32 0.001, %v666_v50  ;;  %764 = vst.msk [vmem:[%s2303_s14 + $0x8] sm:$0xff] %vm182_vm1, %v672_v48  ;;  %v959_v39 = vadd.f32 %v1367_v56, %v840_v26  ;;  %v953_v4 = vpop.f32.mrb[7].mxu1  ;;  %v822_v26 = vld [vmem:[%s2302_s19 + $0x18] sm:$0xff]  ;;  %v821_v46 = vld [vmem:[%s2302_s19 + $0x10] sm:$0xff] }
 0x503   :  { %v2034_v6 = vmul.f32 %v1912_v25, %v671_v53  ;;  %v2036_v41 = vadd.f32 %v653_v54, %v649_v33  ;;  %v669_v9 = vmul.f32 0.001, %v665_v55  ;;  %763 = vst.msk [vmem:[%s2303_s14] sm:$0xff] %vm182_vm1, %v671_v53  ;;  %v954_v63 = vadd.f32 %v953_v4, %v839_v47 }
 0x504   :  { %1458 = vrsqrt.f32 %v2025_v60  ;;  %762 = vst.msk [vmem:[%s2300_s29 + $0x18] sm:$0xff] %vm182_vm1, %v2027_v61  ;;  %v674_v17 = vadd.f32 %v670_v62, %v662_v21  ;;  %v977_v20 = vmul.f32 0.1, %v959_v39  ;;  %v989_v22 = vmul.f32 %v959_v39, %v959_v39 }
 0x505   :  { %1460 = vrsqrt.f32 %v2034_v6  ;;  %761 = vst.msk [vmem:[%s2300_s29 + $0x10] sm:$0xff] %vm182_vm1, %v2036_v41  ;;  %v1370_v15 = vpop.f32.mrb[8].mxu1  ;;  %v673_v18 = vadd.f32 %v669_v9, %v661_v43  ;;  %v976_v23 = vmul.f32 0.1, %v954_v63  ;;  %v988_v24 = vmul.f32 %v954_v63, %v954_v63 }
 0x506   :  { %v963_v8 = vpop.f32.mrb[9].mxu1  ;;  %v969_v27 = vadd.f32 %v1370_v15, %v842_v52  ;;  %v2051_v32 = vmul.f32 %v1912_v25, %v674_v17  ;;  %766 = vst.msk [vmem:[%s2303_s14 + $0x18] sm:$0xff] %vm182_vm1, %v674_v17  ;;  %v2060_v21 = vadd.f32 %v977_v20, %v973_v10  ;;  %v993_v35 = vmul.f32 0.001, %v989_v22 }
 0x507   :  { %v964_v30 = vadd.f32 %v963_v8, %v841_v19  ;;  %v2054_v33 = vmul.f32 %v1912_v25, %v673_v18  ;;  %765 = vst.msk [vmem:[%s2303_s14 + $0x10] sm:$0xff] %vm182_vm1, %v673_v18  ;;  %v2062_v38 = vadd.f32 %v976_v23, %v972_v42  ;;  %v992_v40 = vmul.f32 0.001, %v988_v24 }
 0x508   :  { %v979_v7 = vmul.f32 0.1, %v969_v27  ;;  %v991_v43 = vmul.f32 %v969_v27, %v969_v27  ;;  %1462 = vrsqrt.f32 %v2051_v32  ;;  %v987_v45 = vmul.f32 0.999, %v822_v26  ;;  %1084 = vst.msk [vmem:[%s2304_s3 + $0x8] sm:$0xff] %vm336_vm3, %v2060_v21  ;;  %v497_v26 = vld [vmem:[%s2306_s24 + $0x8] sm:$0xff] }
 0x509   :  { %1464 = vrsqrt.f32 %v2054_v33  ;;  %v974_v47 = vmul.f32 0.9, %v817_v29  ;;  %1083 = vst.msk [vmem:[%s2304_s3] sm:$0xff] %vm336_vm3, %v2062_v38  ;;  %v997_v48 = vadd.f32 %v993_v35, %v985_v11  ;;  %v996_v49 = vadd.f32 %v992_v40, %v984_v14 }
 0x50a   :  { %v2073_v50 = vadd.f32 %v979_v7, %v975_v16  ;;  %v995_v52 = vmul.f32 0.001, %v991_v43  ;;  %v978_v53 = vmul.f32 0.1, %v964_v30  ;;  %v990_v54 = vmul.f32 %v964_v30, %v964_v30  ;;  %v496_v43 = vld [vmem:[%s2306_s24] sm:$0xff] }
 0x50b   :  { %v2076_v57 = vmul.f32 %v997_v48, %v1912_v25  ;;  %v2079_v58 = vmul.f32 %v996_v49, %v1912_v25  ;;  %v986_v59 = vmul.f32 0.999, %v821_v46  ;;  %1087 = vst.msk [vmem:[%s2305_s21] sm:$0xff] %vm336_vm3, %v996_v49  ;;  %1088 = vst.msk [vmem:[%s2305_s21 + $0x8] sm:$0xff] %vm336_vm3, %v997_v48  ;;  %vm689_vm14 = vcmp.eq.f32.partialorder %v2025_v60, inf  ;;  %v499_v46 = vld [vmem:[%s2306_s24 + $0x18] sm:$0xff] }
 0x50c   :  { %v999_v56 = vadd.f32 %v995_v52, %v987_v45  ;;  %1086 = vst.msk [vmem:[%s2304_s3 + $0x18] sm:$0xff] %vm336_vm3, %v2073_v50  ;;  %v2090_v39 = vadd.f32 %v978_v53, %v974_v47  ;;  %v994_v3 = vmul.f32 0.001, %v990_v54  ;;  %vm691_vm15 = vcmp.eq.f32.partialorder %v2025_v60, 0.0  ;;  %v498_v47 = vld [vmem:[%s2306_s24 + $0x10] sm:$0xff] }
 0x50d   :  { %v692_v4 = vand.u32 2147483648, %v2025_v60  ;;  %1466 = vrsqrt.f32 %v2076_v57  ;;  %vm682_vm0 = vcmp.eq.f32.partialorder %v2034_v6, inf  ;;  %v685_v63 = vand.u32 2147483648, %v2034_v6 }
 0x50e   :  { %v1459_v55 = vpop.eup %1458  ;;  %1090 = vst.msk [vmem:[%s2305_s21 + $0x18] sm:$0xff] %vm336_vm3, %v999_v56  ;;  %1468 = vrsqrt.f32 %v2079_v58  ;;  %1085 = vst.msk [vmem:[%s2304_s3 + $0x10] sm:$0xff] %vm336_vm3, %v2090_v39  ;;  %vm684_vm2 = vcmp.eq.f32.partialorder %v2034_v6, 0.0  ;;  %v2108_v15 = vmul.f32 %v999_v56, %v1912_v25  ;;  %vm703_vm4 = vcmp.eq.f32.partialorder %v2051_v32, inf }
 0x50f   :  { %v1461_v19 = vpop.eup %1460  ;;  %v688_v62 = vmul.f32 %v1459_v55, %v2025_v60  ;;  %vm705_vm5 = vcmp.eq.f32.partialorder %v2051_v32, 0.0  ;;  %vm696_vm6 = vcmp.eq.f32.partialorder %v2054_v33, inf  ;;  %v699_v24 = vand.u32 2147483648, %v2054_v33 }
 0x510   :  { %v681_v51 = vmul.f32 %v1461_v19, %v2034_v6  ;;  %vm698_vm7 = vcmp.eq.f32.partialorder %v2054_v33, 0.0  ;;  %v721_v7 = vmul.f32 0.95, %v497_v26  ;;  %vm1013_vm8 = vcmp.eq.f32.partialorder %v2076_v57, inf }
 0x511   :  { %v690_v9 = vsel %vm689_vm14, %v2025_v60, %v688_v62  ;;  %v998_v60 = vadd.f32 %v994_v3, %v986_v59  ;;  %v1016_v48 = vand.u32 2147483648, %v2076_v57  ;;  %vm1015_vm9 = vcmp.eq.f32.partialorder %v2076_v57, 0.0 }
 0x512   :  { %v693_v10 = vsel %vm691_vm15, %v692_v4, %v690_v9  ;;  %v683_v11 = vsel %vm682_vm0, %v2034_v6, %v681_v51  ;;  %v1463_v16 = vpop.eup %1462  ;;  %v706_v6 = vand.u32 2147483648, %v2051_v32  ;;  %vm1006_vm10 = vcmp.eq.f32.partialorder %v2079_v58, inf }
 0x513   :  { %v709_v42 = vadd.f32 1e-08, %v693_v10  ;;  %v686_v14 = vsel %vm684_vm2, %v685_v63, %v683_v11  ;;  %v1465_v18 = vpop.eup %1464  ;;  %v702_v20 = vmul.f32 %v1463_v16, %v2051_v32  ;;  %1089 = vst.msk [vmem:[%s2305_s21 + $0x10] sm:$0xff] %vm336_vm3, %v998_v60  ;;  %v2118_v8 = vmul.f32 %v998_v60, %v1912_v25  ;;  %v501_v10 = vld [vmem:[%s2307_s30 + $0x8] sm:$0xff]  ;;  %v500_v60 = vld [vmem:[%s2307_s30] sm:$0xff] }
 0x514   :  { %v708_v17 = vadd.f32 1e-08, %v686_v14  ;;  %v695_v22 = vmul.f32 %v1465_v18, %v2054_v33  ;;  %v1009_v52 = vand.u32 2147483648, %v2079_v58  ;;  %v720_v53 = vmul.f32 0.95, %v496_v43  ;;  %v503_v43 = vld [vmem:[%s2307_s30 + $0x18] sm:$0xff] }
 0x515   :  { %1470 = vrcp.f32 %v709_v42  ;;  %v704_v23 = vsel %vm703_vm4, %v2051_v32, %v702_v20  ;;  %vm1008_vm11 = vcmp.eq.f32.partialorder %v2079_v58, 0.0  ;;  %v2141_v59 = vmul.f32 0.95, %v499_v46 }
 0x516   :  { %1472 = vrcp.f32 %v708_v17  ;;  %v707_v27 = vsel %vm705_vm5, %v706_v6, %v704_v23  ;;  %v697_v29 = vsel %vm696_vm6, %v2054_v33, %v695_v22  ;;  %v2143_v19 = vmul.f32 0.95, %v498_v47 }
 0x517   :  { %1474 = vrsqrt.f32 %v2108_v15  ;;  %v711_v25 = vadd.f32 1e-08, %v707_v27  ;;  %v700_v30 = vsel %vm698_vm7, %v699_v24, %v697_v29  ;;  %v1467_v35 = vpop.eup %1466  ;;  %vm1027_vm12 = vcmp.eq.f32.partialorder %v2108_v15, inf }
 0x518   :  { %1476 = vrsqrt.f32 %v2118_v8  ;;  %v710_v32 = vadd.f32 1e-08, %v700_v30  ;;  %v1469_v40 = vpop.eup %1468  ;;  %v1012_v45 = vmul.f32 %v1467_v35, %v2076_v57  ;;  %vm1029_vm13 = vcmp.eq.f32.partialorder %v2108_v15, 0.0 }
 0x519   :  { %1478 = vrcp.f32 %v711_v25  ;;  %v1005_v33 = vmul.f32 %v1469_v40, %v2079_v58  ;;  %v1030_v16 = vand.u32 2147483648, %v2108_v15  ;;  %vm1020_vm14 = vcmp.eq.f32.partialorder %v2118_v8, inf }
 0x51a   :  { %1480 = vrcp.f32 %v710_v32  ;;  %v1014_v49 = vsel %vm1013_vm8, %v2076_v57, %v1012_v45  ;;  %vm1022_vm15 = vcmp.eq.f32.partialorder %v2118_v8, 0.0  ;;  %v1023_v22 = vand.u32 2147483648, %v2118_v8 }
 0x51b   :  { %v1017_v54 = vsel %vm1015_vm9, %v1016_v48, %v1014_v49  ;;  %v1007_v55 = vsel %vm1006_vm10, %v2079_v58, %v1005_v33 }
 0x51c   :  { %v1033_v62 = vadd.f32 1e-08, %v1017_v54  ;;  %v1010_v3 = vsel %vm1008_vm11, %v1009_v52, %v1007_v55 }
 0x51d   :  { %v1032_v9 = vadd.f32 1e-08, %v1010_v3 }
 0x51e   :  { %1482 = vrcp.f32 %v1033_v62 }
 0x51f   :  { %v1471_v56 = vpop.eup %1470  ;;  %1484 = vrcp.f32 %v1032_v9 }
 0x520   :  { %v1473_v57 = vpop.eup %1472  ;;  %v726_v4 = vmul.f32 %v1471_v56, %v2008_v36  ;;  %v740_v51 = vmul.f32 %v1471_v56, %v1959_v28 }
 0x521   :  { %v1475_v63 = vpop.eup %1474  ;;  %v725_v58 = vmul.f32 %v1473_v57, %v2010_v44  ;;  %v739_v11 = vmul.f32 %v1473_v57, %v1959_v28  ;;  %v828_v57 = vld [vmem:[%s2310_s7 + $0x8] sm:$0xff] }
 0x522   :  { %v1477_v42 = vpop.eup %1476  ;;  %v731_v14 = vmul.f32 %v1962_v31, %v726_v4  ;;  %v1026_v36 = vmul.f32 %v1475_v63, %v2108_v15  ;;  %v744_v20 = vmul.f32 %v740_v51, %v501_v10  ;;  %v827_v10 = vld [vmem:[%s2310_s7] sm:$0xff] }
 0x523   :  { %v730_v17 = vmul.f32 %v1962_v31, %v725_v58  ;;  %v1019_v18 = vmul.f32 %v1477_v42, %v2118_v8  ;;  %v1479_v23 = vpop.eup %1478  ;;  %v743_v26 = vmul.f32 %v739_v11, %v500_v60  ;;  %v826_v42 = vld [vmem:[%s2308_s6 + $0x18] sm:$0xff]  ;;  %v825_v60 = vld [vmem:[%s2308_s6 + $0x10] sm:$0xff] }
 0x524   :  { %v735_v44 = vsub.f32 %v721_v7, %v731_v14  ;;  %v1028_v6 = vsel %vm1027_vm12, %v2108_v15, %v1026_v36  ;;  %v1481_v25 = vpop.eup %1480  ;;  %v728_v35 = vmul.f32 %v1479_v23, %v2027_v61  ;;  %v742_v32 = vmul.f32 %v1479_v23, %v1959_v28  ;;  %v502_v61 = vld [vmem:[%s2307_s30 + $0x10] sm:$0xff] }
 0x525   :  { %v734_v24 = vsub.f32 %v720_v53, %v730_v17  ;;  %v1031_v27 = vsel %vm1029_vm13, %v1030_v16, %v1028_v6  ;;  %v1021_v29 = vsel %vm1020_vm14, %v2118_v8, %v1019_v18  ;;  %v727_v45 = vmul.f32 %v1481_v25, %v2036_v41  ;;  %v824_v41 = vld [vmem:[%s2308_s6 + $0x8] sm:$0xff] }
 0x526   :  { %v748_v30 = vadd.f32 %v744_v20, %v735_v44  ;;  %v1035_v40 = vadd.f32 1e-08, %v1031_v27  ;;  %v741_v15 = vmul.f32 %v1481_v25, %v1959_v28  ;;  %v1024_v46 = vsel %vm1022_vm15, %v1023_v22, %v1021_v29  ;;  %v1490_v20 = vld [vmem:[%s1638_s25 + $0x8] sm:$0xff]  ;;  %v830_v22 = vld [vmem:[%s2310_s7 + $0x18] sm:$0xff] }
 0x527   :  { %v747_v7 = vadd.f32 %v743_v26, %v734_v24  ;;  %v733_v48 = vmul.f32 %v1962_v31, %v728_v35  ;;  %v732_v49 = vmul.f32 %v1962_v31, %v727_v45  ;;  %v1034_v28 = vadd.f32 1e-08, %v1024_v46  ;;  %v1491_v24 = vld [vmem:[%s1638_s25] sm:$0xff] }
 0x528   :  { %v752_v47 = vadd.f32 %v748_v30, %v1840_v1  ;;  %768 = vst.msk [vmem:[%s1818_s4 + $0x8] sm:$0xff] %vm182_vm1, %v748_v30  ;;  %1486 = vrcp.f32 %v1035_v40  ;;  %v746_v52 = vmul.f32 %v742_v32, %v503_v43  ;;  %v823_v1 = vld [vmem:[%s2308_s6] sm:$0xff]  ;;  %v1483_v53 = vpop.eup %1482  ;;  %v745_v55 = vmul.f32 %v741_v15, %v502_v61  ;;  %v829_v32 = vld [vmem:[%s2310_s7 + $0x10] sm:$0xff] }
 0x529   :  { %v751_v33 = vadd.f32 %v747_v7, %v1837_v0  ;;  %767 = vst.msk [vmem:[%s1818_s4] sm:$0xff] %vm182_vm1, %v747_v7  ;;  %v737_v8 = vsub.f32 %v2141_v59, %v733_v48  ;;  %v736_v54 = vsub.f32 %v2143_v19, %v732_v49  ;;  %1488 = vrcp.f32 %v1034_v28  ;;  %v1485_v0 = vpop.eup %1484 }
 0x52a   :  { %756 = vst.msk [vmem:[%s2309_s12 + $0x8] sm:$0xff] %vm182_vm1, %v752_v47  ;;  %v1045_v56 = vmul.f32 0.95, %v824_v41  ;;  %v1050_v59 = vmul.f32 %v1483_v53, %v2060_v21  ;;  %v1064_v62 = vmul.f32 %v1483_v53, %v1922_v34  ;;  %v1044_v4 = vmul.f32 0.95, %v823_v1 }
 0x52b   :  { %755 = vst.msk [vmem:[%s2309_s12] sm:$0xff] %vm182_vm1, %v751_v33  ;;  %v750_v31 = vadd.f32 %v746_v52, %v737_v8  ;;  %v749_v3 = vadd.f32 %v745_v55, %v736_v54  ;;  %v1049_v19 = vmul.f32 %v1485_v0, %v2062_v38  ;;  %v1063_v51 = vmul.f32 %v1485_v0, %v1922_v34 }
 0x52c   :  { %v1055_v63 = vmul.f32 %v1925_v37, %v1050_v59  ;;  %v1068_v11 = vmul.f32 %v1064_v62, %v828_v57  ;;  %v1047_v17 = vmul.f32 0.95, %v826_v42  ;;  %v1046_v29 = vmul.f32 0.95, %v825_v60 }
 0x52d   :  { %v754_v9 = vadd.f32 %v750_v31, %v1849_v5  ;;  %770 = vst.msk [vmem:[%s1818_s4 + $0x18] sm:$0xff] %vm182_vm1, %v750_v31  ;;  %v753_v21 = vadd.f32 %v749_v3, %v1843_v2  ;;  %769 = vst.msk [vmem:[%s1818_s4 + $0x10] sm:$0xff] %vm182_vm1, %v749_v3  ;;  %v1054_v58 = vmul.f32 %v1925_v37, %v1049_v19  ;;  %s2311_s4 = sld [smem:[#allocation30_spill]] }
 0x52e   :  { %v1059_v38 = vsub.f32 %v1045_v56, %v1055_v63  ;;  %v1067_v14 = vmul.f32 %v1063_v51, %v827_v10 }
 0x52f   :  { %758 = vst.msk [vmem:[%s2309_s12 + $0x18] sm:$0xff] %vm182_vm1, %v754_v9  ;;  %757 = vst.msk [vmem:[%s2309_s12 + $0x10] sm:$0xff] %vm182_vm1, %v753_v21  ;;  %v1058_v5 = vsub.f32 %v1044_v4, %v1054_v58 }
 0x530   :  { %v1072_v36 = vadd.f32 %v1068_v11, %v1059_v38 }
 0x531   :  { %v1071_v16 = vadd.f32 %v1067_v14, %v1058_v5 }
 0x532   :  { %v1487_v2 = vpop.eup %1486  ;;  %v1076_v6 = vadd.f32 %v1490_v20, %v1072_v36  ;;  %1092 = vst.msk [vmem:[%s1828_s20 + $0x8] sm:$0xff] %vm336_vm3, %v1072_v36 }
 0x533   :  { %v1052_v18 = vmul.f32 %v1487_v2, %v2073_v50  ;;  %v1066_v44 = vmul.f32 %v1487_v2, %v1922_v34  ;;  %v1489_v23 = vpop.eup %1488  ;;  %v1075_v26 = vadd.f32 %v1491_v24, %v1071_v16  ;;  %1091 = vst.msk [vmem:[%s1828_s20] sm:$0xff] %vm336_vm3, %v1071_v16 }
 0x534   :  { %v1051_v50 = vmul.f32 %v1489_v23, %v2090_v39  ;;  %v1065_v25 = vmul.f32 %v1489_v23, %v1922_v34  ;;  %1080 = vst.msk [vmem:[%s2311_s4 + $0x8] sm:$0xff] %vm336_vm3, %v1076_v6 }
 0x535   :  { %v1057_v27 = vmul.f32 %v1925_v37, %v1052_v18  ;;  %v1070_v35 = vmul.f32 %v1066_v44, %v830_v22  ;;  %1079 = vst.msk [vmem:[%s2311_s4] sm:$0xff] %vm336_vm3, %v1075_v26 }
 0x536   :  { %v1056_v40 = vmul.f32 %v1925_v37, %v1051_v50  ;;  %v1069_v45 = vmul.f32 %v1065_v25, %v829_v32 }
 0x537   :  { %v1061_v30 = vsub.f32 %v1047_v17, %v1057_v27 }
 0x538   :  { %v1060_v43 = vsub.f32 %v1046_v29, %v1056_v40 }
 0x539   :  { %v1074_v7 = vadd.f32 %v1070_v35, %v1061_v30 }
 0x53a   :  { %v1073_v39 = vadd.f32 %v1069_v45, %v1060_v43 }
 0x53b   :  { %v1078_v15 = vadd.f32 %v1074_v7, %v1874_v13  ;;  %1094 = vst.msk [vmem:[%s1828_s20 + $0x18] sm:$0xff] %vm336_vm3, %v1074_v7 }
 0x53c   :  { %v1077_v34 = vadd.f32 %v1073_v39, %v1871_v12  ;;  %1093 = vst.msk [vmem:[%s1828_s20 + $0x10] sm:$0xff] %vm336_vm3, %v1073_v39 }
 0x53d   :  { %1082 = vst.msk [vmem:[%s2311_s4 + $0x18] sm:$0xff] %vm336_vm3, %v1078_v15 }
 0x53e   :  { %1081 = vst.msk [vmem:[%s2311_s4 + $0x10] sm:$0xff] %vm336_vm3, %v1077_v34 }
 0x53f   :  { %1550 = dma.done.wait [#allocation3], 16  }
 0x540   :  { %1551 = vsyncadd [#allocation3], 4294967280 }
 0x541   :  { %1552 = dma.done.wait [#allocation7], 128  }
 0x542   :  { %1553 = vsyncadd [#allocation7], 4294967168 }
 0x543   :  { %1225 = vsyncpa [#allocation3], 1 }
 0x544   :  { %1226 = vsyncpa [#allocation7], 1 }
 0x545   :  { %1227 = vsyncpa [#allocation4], 1 }

</bundles_post_ra>
